<compile_context>
chip_gen: v6e
topology: v6e:2x2x1
jax: 0.10.0
libtpu: 0.0.40
codegen_flags: <defaults>
</compile_context>

<pallas_src>
import functools
import math

import jax
import jax.numpy as jnp
from jax.experimental import pallas as pl
from jax.experimental.pallas import tpu as pltpu


# ---------------------------------------------------------------------------
# Fused kernel.  Ref order:  x, (w, bgb) * depth, wf, bf, out
#   bgb packs (bias, gamma, beta) as a (3, H_pad) block.
# ---------------------------------------------------------------------------
def _fused_head_kernel(*refs, eps, depth, true_hidden):
    x_ref = refs[0]
    layer_refs = refs[1:1 + 2 * depth]
    wf_ref, bf_ref, o_ref = refs[1 + 2 * depth:]

    inv_sqrt2 = 1.0 / math.sqrt(2.0)
    inv_h = 1.0 / float(true_hidden)
    h_pad = layer_refs[1].shape[-1]            # padded (lane-dense) hidden width

    # Static lane mask for LN stats when hidden_dim was zero-padded to 128*k.
    if h_pad != true_hidden:
        lane = jax.lax.broadcasted_iota(jnp.int32, (1, h_pad), 1)
        ln_mask = lane < true_hidden
    else:
        ln_mask = None

    h = x_ref[...].astype(jnp.float32)

    for i in range(depth):                     # static unroll (depth is small)
        w_ref, bgb_ref = layer_refs[2 * i], layer_refs[2 * i + 1]
        w = w_ref[...]                         # stored dtype (bf16 in prod path)
        bgb = bgb_ref[...].astype(jnp.float32)
        b, gamma, beta = bgb[0:1, :], bgb[1:2, :], bgb[2:3, :]

        # Linear: bf16 (or f32) operands on the MXU, f32 accumulation.
        y = jnp.dot(h.astype(w.dtype), w,
                    preferred_element_type=jnp.float32) + b       # (TM, H_pad)

        # Two-pass LayerNorm stats over the true hidden lanes only.
        # Padded lanes of y are exactly 0, so they don't perturb the sum.
        mean = jnp.sum(y, axis=-1, keepdims=True) * inv_h
        d = y - mean
        dm = d if ln_mask is None else jnp.where(ln_mask, d, 0.0)
        var = jnp.sum(dm * dm, axis=-1, keepdims=True) * inv_h
        y_ln = d * jax.lax.rsqrt(var + eps) * gamma + beta
        # Padded lanes: gamma = beta = 0  ->  y_ln = 0  ->  GELU(0) = 0.

        # Exact GELU (erf) for parity with nn.GELU() default.
        h = 0.5 * y_ln * (1.0 + jax.lax.erf(y_ln * inv_sqrt2))

    wf = wf_ref[...]
    bf = bf_ref[...].astype(jnp.float32)
    out = jnp.dot(h.astype(wf.dtype), wf,
                  preferred_element_type=jnp.float32) + bf
    o_ref[...] = out.astype(o_ref.dtype)


# ---------------------------------------------------------------------------
# Wrapper
# ---------------------------------------------------------------------------
def _round_up(x, m):
    return (x + m - 1) // m * m


def head_with_layernorm_forward(params, x, *, eps=1e-5,
                                matmul_dtype=jnp.bfloat16,
                                max_batch_tile=512):
    B, in_dim = x.shape
    layers = params["layers"]
    depth = len(layers)
    hidden_dim = layers[0][0].shape[1]
    wf, bf = params["final"]
    out_dim = wf.shape[1]
    dtype = x.dtype

    # ---- lane-dense padding: every matmul dim -> multiple of 128 -----------
    in_pad = _round_up(in_dim, 128)
    hid_pad = _round_up(hidden_dim, 128)
    out_pad = _round_up(out_dim, 128)

    # ---- batch tile ---------------------------------------------------------
    B8 = _round_up(B, 8)
    # keep >= 2 grid steps when the batch allows it (v7x has 2 TensorCores)
    half = _round_up((B8 + 1) // 2, 8) if B8 > 8 else 8
    TM = max(8, min(max_batch_tile, B8, half))
    # limit dead padded rows to < TM/2
    while TM > 8 and (_round_up(B, TM) - B) * 2 >= TM:
        TM -= 8
    B_pad = _round_up(B, TM)
    grid = (B_pad // TM,)

    x_p = jnp.pad(x, ((0, B_pad - B), (0, in_pad - in_dim)))

    # ---- pad + pre-cast weights; pack (b, gamma, beta) per layer ------------
    layer_inputs = []
    for i, (w, b, gamma, beta) in enumerate(layers):
        d_in = in_dim if i == 0 else hidden_dim
        d_in_pad = in_pad if i == 0 else hid_pad
        w_p = jnp.pad(w, ((0, d_in_pad - d_in),
                          (0, hid_pad - hidden_dim))).astype(matmul_dtype)
        pad1 = lambda v: jnp.pad(v, (0, hid_pad - hidden_dim))
        bgb = jnp.stack([pad1(b), pad1(gamma), pad1(beta)]).astype(jnp.float32)
        layer_inputs.append((w_p, bgb))
    wf_p = jnp.pad(wf, ((0, hid_pad - hidden_dim),
                        (0, out_pad - out_dim))).astype(matmul_dtype)
    bf_p = jnp.pad(bf, (0, out_pad - out_dim)).astype(jnp.float32).reshape(1, out_pad)

    inputs = [x_p]
    for w_p, bgb in layer_inputs:
        inputs += [w_p, bgb]
    inputs += [wf_p, bf_p]

    # ---- VMEM budget + cost estimate ----------------------------------------
    pinned_bytes = sum(int(a.size) * a.dtype.itemsize for a in inputs[1:])
    stream_bytes = TM * in_pad * x_p.dtype.itemsize + TM * out_pad * dtype.itemsize
    interm_bytes = 6 * TM * max(in_pad, hid_pad, out_pad) * 4
    est = 2 * pinned_bytes + 2 * stream_bytes + interm_bytes
    vmem_limit = int(min(64 * 2 ** 20, max(32 * 2 ** 20, 2 * est)))

    flops = 2 * B_pad * (in_pad * hid_pad
                         + (depth - 1) * hid_pad * hid_pad
                         + hid_pad * out_pad)
    cost = pl.CostEstimate(
        flops=int(flops),
        transcendentals=int(depth * B_pad * hid_pad),
        bytes_accessed=int(pinned_bytes
                           + int(x_p.size) * x_p.dtype.itemsize
                           + B_pad * out_pad * dtype.itemsize),
    )

    kernel = functools.partial(_fused_head_kernel, eps=eps, depth=depth,
                               true_hidden=hidden_dim)
    pinned = lambda i: (0, 0)       # weights stay resident across grid steps

    def make_call(single_buffer_weights):
        def pinned_spec(shape):
            if single_buffer_weights:
                # grid-invariant block: one VMEM buffer is enough
                return pl.BlockSpec(shape, pinned, pipeline_mode=pl.Buffered(1))
            return pl.BlockSpec(shape, pinned)

        in_specs = [pl.BlockSpec((TM, in_pad), lambda i: (i, 0))]
        for w_p, bgb in layer_inputs:
            in_specs += [pinned_spec(w_p.shape), pinned_spec(bgb.shape)]
        in_specs += [pinned_spec(wf_p.shape), pinned_spec(bf_p.shape)]

        return pl.pallas_call(
            kernel,
            out_shape=jax.ShapeDtypeStruct((B_pad, out_pad), dtype),
            grid=grid,
            in_specs=in_specs,
            out_specs=pl.BlockSpec((TM, out_pad), lambda i: (i, 0)),
            compiler_params=pltpu.CompilerParams(
                dimension_semantics=("parallel",),
                vmem_limit_bytes=vmem_limit),
            cost_estimate=cost,
        )

    try:
        out_padded = make_call(True)(*inputs)
    except Exception:
        # jax version without BlockSpec.pipeline_mode support: fall back to
        # default double-buffered weight blocks (correctness unaffected).
        out_padded = make_call(False)(*inputs)

    return out_padded[:B, :out_dim]


# ---------------------------------------------------------------------------
# Parameter init (PyTorch-style Kaiming-uniform Linear, ones/zeros LayerNorm)
# Weights stored as (in_features, out_features) so the kernel computes x @ W.
# ---------------------------------------------------------------------------
def init_params(key, in_dim, hidden_dim, out_dim, depth):
    params = {"layers": [], "final": None}
    for i in range(depth):
        d_in = in_dim if i == 0 else hidden_dim
        key, kw, kb = jax.random.split(key, 3)
        bound = 1.0 / math.sqrt(d_in)
        w = jax.random.uniform(kw, (d_in, hidden_dim), jnp.float32, -bound, bound)
        b = jax.random.uniform(kb, (hidden_dim,), jnp.float32, -bound, bound)
        gamma = jnp.ones((hidden_dim,), jnp.float32)
        beta = jnp.zeros((hidden_dim,), jnp.float32)
        params["layers"].append((w, b, gamma, beta))
    key, kw, kb = jax.random.split(key, 3)
    bound = 1.0 / math.sqrt(hidden_dim)
    wf = jax.random.uniform(kw, (hidden_dim, out_dim), jnp.float32, -bound, bound)
    bf = jax.random.uniform(kb, (out_dim,), jnp.float32, -bound, bound)
    params["final"] = (wf, bf)
    return params


# Pure-JAX reference for the correctness check
def reference_forward(params, x, eps=1e-5):
    h = x
    for (w, b, gamma, beta) in params["layers"]:
        y = h @ w + b
        mean = jnp.mean(y, axis=-1, keepdims=True)
        var = jnp.mean((y - mean) ** 2, axis=-1, keepdims=True)
        y = (y - mean) / jnp.sqrt(var + eps) * gamma + beta
        h = 0.5 * y * (1.0 + jax.lax.erf(y / math.sqrt(2.0)))
    wf, bf = params["final"]
    return h @ wf + bf


if __name__ == "__main__":
    key = jax.random.PRNGKey(0)
    k_param, k_x = jax.random.split(key)

    batch, in_dim, hidden_dim, out_dim, depth = 16, 48, 96, 24, 2
    params = init_params(k_param, in_dim, hidden_dim, out_dim, depth)
    x = jax.random.normal(k_x, (batch, in_dim), jnp.float32)

    ref = reference_forward(params, x)

    # Strict-precision path (f32 matmul operands): exact parity check.
    out_f32 = jax.block_until_ready(
        head_with_layernorm_forward(params, x, matmul_dtype=jnp.float32))
    assert out_f32.shape == (batch, out_dim)
    assert jnp.allclose(out_f32, ref, atol=1e-4, rtol=1e-4), "f32 path mismatch"

    # Production path (bf16 matmul operands, f32 accumulate + f32 LN/GELU).
    out_bf16 = jax.block_until_ready(head_with_layernorm_forward(params, x))
    assert out_bf16.shape == (batch, out_dim)
    assert jnp.allclose(out_bf16, ref, atol=5e-2, rtol=5e-2), "bf16 path mismatch"

    print("KERNEL_OK")
</pallas_src>

<mosaic_0001>
module attributes {stable_mosaic.version = 11 : i64} {
  func.func @_fused_head_kernel(%arg0: i32, %arg1: memref<8x128xf32, #tpu.memory_space<vmem>>, %arg2: memref<128x128xf32, #tpu.memory_space<vmem>>, %arg3: memref<3x128xf32, #tpu.memory_space<vmem>>, %arg4: memref<128x128xf32, #tpu.memory_space<vmem>>, %arg5: memref<3x128xf32, #tpu.memory_space<vmem>>, %arg6: memref<128x128xf32, #tpu.memory_space<vmem>>, %arg7: memref<1x128xf32, #tpu.memory_space<vmem>>, %arg8: memref<8x128xf32, #tpu.memory_space<vmem>>) attributes {dimension_semantics = [#tpu.dimension_semantics<parallel>], iteration_bounds = array<i64: 2>, scalar_prefetch = 0 : i64, scratch_operands = 0 : i64, tpu.core_type = #tpu.core_type<tc>, window_params = [{transform_indices = @transform_0, window_bounds = array<i64: 8, 128>}, {pipeline_mode = #tpu.pipeline_mode<synchronous>, transform_indices = @transform_1, window_bounds = array<i64: 128, 128>}, {pipeline_mode = #tpu.pipeline_mode<synchronous>, transform_indices = @transform_2, window_bounds = array<i64: 3, 128>}, {pipeline_mode = #tpu.pipeline_mode<synchronous>, transform_indices = @transform_3, window_bounds = array<i64: 128, 128>}, {pipeline_mode = #tpu.pipeline_mode<synchronous>, transform_indices = @transform_4, window_bounds = array<i64: 3, 128>}, {pipeline_mode = #tpu.pipeline_mode<synchronous>, transform_indices = @transform_5, window_bounds = array<i64: 128, 128>}, {pipeline_mode = #tpu.pipeline_mode<synchronous>, transform_indices = @transform_6, window_bounds = array<i64: 1, 128>}, {transform_indices = @transform_7, window_bounds = array<i64: 8, 128>}]} {
    %0 = tpu.iota {dimensions = array<i32: 1>} : vector<1x128xi32>
    %c96_i32 = arith.constant 96 : i32
    %1 = vector.broadcast %c96_i32 : i32 to vector<1x128xi32>
    %2 = arith.cmpi slt, %0, %1 : vector<1x128xi32>
    %c0 = arith.constant 0 : index
    %c0_0 = arith.constant 0 : index
    %3 = vector.load %arg1[%c0, %c0_0] : memref<8x128xf32, #tpu.memory_space<vmem>>, vector<8x128xf32>
    %c0_1 = arith.constant 0 : index
    %c0_2 = arith.constant 0 : index
    %4 = vector.load %arg2[%c0_1, %c0_2] : memref<128x128xf32, #tpu.memory_space<vmem>>, vector<128x128xf32>
    %c0_3 = arith.constant 0 : index
    %c0_4 = arith.constant 0 : index
    %5 = vector.load %arg3[%c0_3, %c0_4] : memref<3x128xf32, #tpu.memory_space<vmem>>, vector<3x128xf32>
    %6 = vector.extract_strided_slice %5 {offsets = [0, 0], sizes = [1, 128], strides = [1, 1]} : vector<3x128xf32> to vector<1x128xf32>
    %7 = vector.extract_strided_slice %5 {offsets = [1, 0], sizes = [1, 128], strides = [1, 1]} : vector<3x128xf32> to vector<1x128xf32>
    %8 = vector.extract_strided_slice %5 {offsets = [2, 0], sizes = [1, 128], strides = [1, 1]} : vector<3x128xf32> to vector<1x128xf32>
    %cst = arith.constant dense<0.000000e+00> : vector<8x128xf32>
    %9 = tpu.matmul %3, %4, %cst {dimension_numbers = #tpu.dot_dimension_numbers<[1], [0], [0], [1], [0, 0, 1, 1], [], []>} : vector<8x128xf32>, vector<128x128xf32>, vector<8x128xf32> -> vector<8x128xf32>
    %10 = vector.broadcast %6 : vector<1x128xf32> to vector<8x128xf32>
    %11 = arith.addf %9, %10 : vector<8x128xf32>
    %cst_5 = arith.constant dense<0.000000e+00> : vector<8xf32>
    %12 = vector.multi_reduction <add>, %11, %cst_5 [1] : vector<8x128xf32> to vector<8xf32>
    %13 = vector.shape_cast %12 : vector<8xf32> to vector<8x1xf32>
    %cst_6 = arith.constant 0.010416667 : f32
    %14 = vector.broadcast %cst_6 : f32 to vector<8x1xf32>
    %15 = arith.mulf %13, %14 : vector<8x1xf32>
    %16 = vector.broadcast %15 : vector<8x1xf32> to vector<8x128xf32>
    %17 = arith.subf %11, %16 : vector<8x128xf32>
    %cst_7 = arith.constant 0.000000e+00 : f32
    %18 = vector.shape_cast %2 : vector<1x128xi1> to vector<1x128xi1>
    %19 = vector.broadcast %18 : vector<1x128xi1> to vector<8x128xi1>
    %20 = vector.broadcast %cst_7 : f32 to vector<8x128xf32>
    %21 = arith.select %19, %17, %20 : vector<8x128xi1>, vector<8x128xf32>
    %22 = arith.mulf %21, %21 : vector<8x128xf32>
    %cst_8 = arith.constant dense<0.000000e+00> : vector<8xf32>
    %23 = vector.multi_reduction <add>, %22, %cst_8 [1] : vector<8x128xf32> to vector<8xf32>
    %24 = vector.shape_cast %23 : vector<8xf32> to vector<8x1xf32>
    %cst_9 = arith.constant 0.010416667 : f32
    %25 = vector.broadcast %cst_9 : f32 to vector<8x1xf32>
    %26 = arith.mulf %24, %25 : vector<8x1xf32>
    %cst_10 = arith.constant 9.99999974E-6 : f32
    %27 = vector.broadcast %cst_10 : f32 to vector<8x1xf32>
    %28 = arith.addf %26, %27 : vector<8x1xf32>
    %29 = math.rsqrt %28 : vector<8x1xf32>
    %30 = vector.broadcast %29 : vector<8x1xf32> to vector<8x128xf32>
    %31 = arith.mulf %17, %30 : vector<8x128xf32>
    %32 = vector.broadcast %7 : vector<1x128xf32> to vector<8x128xf32>
    %33 = arith.mulf %31, %32 : vector<8x128xf32>
    %34 = vector.broadcast %8 : vector<1x128xf32> to vector<8x128xf32>
    %35 = arith.addf %33, %34 : vector<8x128xf32>
    %cst_11 = arith.constant 5.000000e-01 : f32
    %36 = vector.broadcast %cst_11 : f32 to vector<8x128xf32>
    %37 = arith.mulf %36, %35 : vector<8x128xf32>
    %cst_12 = arith.constant 0.707106769 : f32
    %38 = vector.broadcast %cst_12 : f32 to vector<8x128xf32>
    %39 = arith.mulf %35, %38 : vector<8x128xf32>
    %40 = math.erf %39 : vector<8x128xf32>
    %cst_13 = arith.constant 1.000000e+00 : f32
    %41 = vector.broadcast %cst_13 : f32 to vector<8x128xf32>
    %42 = arith.addf %41, %40 : vector<8x128xf32>
    %43 = arith.mulf %37, %42 : vector<8x128xf32>
    %c0_14 = arith.constant 0 : index
    %c0_15 = arith.constant 0 : index
    %44 = vector.load %arg4[%c0_14, %c0_15] : memref<128x128xf32, #tpu.memory_space<vmem>>, vector<128x128xf32>
    %c0_16 = arith.constant 0 : index
    %c0_17 = arith.constant 0 : index
    %45 = vector.load %arg5[%c0_16, %c0_17] : memref<3x128xf32, #tpu.memory_space<vmem>>, vector<3x128xf32>
    %46 = vector.extract_strided_slice %45 {offsets = [0, 0], sizes = [1, 128], strides = [1, 1]} : vector<3x128xf32> to vector<1x128xf32>
    %47 = vector.extract_strided_slice %45 {offsets = [1, 0], sizes = [1, 128], strides = [1, 1]} : vector<3x128xf32> to vector<1x128xf32>
    %48 = vector.extract_strided_slice %45 {offsets = [2, 0], sizes = [1, 128], strides = [1, 1]} : vector<3x128xf32> to vector<1x128xf32>
    %cst_18 = arith.constant dense<0.000000e+00> : vector<8x128xf32>
    %49 = tpu.matmul %43, %44, %cst_18 {dimension_numbers = #tpu.dot_dimension_numbers<[1], [0], [0], [1], [0, 0, 1, 1], [], []>} : vector<8x128xf32>, vector<128x128xf32>, vector<8x128xf32> -> vector<8x128xf32>
    %50 = vector.broadcast %46 : vector<1x128xf32> to vector<8x128xf32>
    %51 = arith.addf %49, %50 : vector<8x128xf32>
    %cst_19 = arith.constant dense<0.000000e+00> : vector<8xf32>
    %52 = vector.multi_reduction <add>, %51, %cst_19 [1] : vector<8x128xf32> to vector<8xf32>
    %53 = vector.shape_cast %52 : vector<8xf32> to vector<8x1xf32>
    %cst_20 = arith.constant 0.010416667 : f32
    %54 = vector.broadcast %cst_20 : f32 to vector<8x1xf32>
    %55 = arith.mulf %53, %54 : vector<8x1xf32>
    %56 = vector.broadcast %55 : vector<8x1xf32> to vector<8x128xf32>
    %57 = arith.subf %51, %56 : vector<8x128xf32>
    %cst_21 = arith.constant 0.000000e+00 : f32
    %58 = vector.shape_cast %2 : vector<1x128xi1> to vector<1x128xi1>
    %59 = vector.broadcast %58 : vector<1x128xi1> to vector<8x128xi1>
    %60 = vector.broadcast %cst_21 : f32 to vector<8x128xf32>
    %61 = arith.select %59, %57, %60 : vector<8x128xi1>, vector<8x128xf32>
    %62 = arith.mulf %61, %61 : vector<8x128xf32>
    %cst_22 = arith.constant dense<0.000000e+00> : vector<8xf32>
    %63 = vector.multi_reduction <add>, %62, %cst_22 [1] : vector<8x128xf32> to vector<8xf32>
    %64 = vector.shape_cast %63 : vector<8xf32> to vector<8x1xf32>
    %cst_23 = arith.constant 0.010416667 : f32
    %65 = vector.broadcast %cst_23 : f32 to vector<8x1xf32>
    %66 = arith.mulf %64, %65 : vector<8x1xf32>
    %cst_24 = arith.constant 9.99999974E-6 : f32
    %67 = vector.broadcast %cst_24 : f32 to vector<8x1xf32>
    %68 = arith.addf %66, %67 : vector<8x1xf32>
    %69 = math.rsqrt %68 : vector<8x1xf32>
    %70 = vector.broadcast %69 : vector<8x1xf32> to vector<8x128xf32>
    %71 = arith.mulf %57, %70 : vector<8x128xf32>
    %72 = vector.broadcast %47 : vector<1x128xf32> to vector<8x128xf32>
    %73 = arith.mulf %71, %72 : vector<8x128xf32>
    %74 = vector.broadcast %48 : vector<1x128xf32> to vector<8x128xf32>
    %75 = arith.addf %73, %74 : vector<8x128xf32>
    %cst_25 = arith.constant 5.000000e-01 : f32
    %76 = vector.broadcast %cst_25 : f32 to vector<8x128xf32>
    %77 = arith.mulf %76, %75 : vector<8x128xf32>
    %cst_26 = arith.constant 0.707106769 : f32
    %78 = vector.broadcast %cst_26 : f32 to vector<8x128xf32>
    %79 = arith.mulf %75, %78 : vector<8x128xf32>
    %80 = math.erf %79 : vector<8x128xf32>
    %cst_27 = arith.constant 1.000000e+00 : f32
    %81 = vector.broadcast %cst_27 : f32 to vector<8x128xf32>
    %82 = arith.addf %81, %80 : vector<8x128xf32>
    %83 = arith.mulf %77, %82 : vector<8x128xf32>
    %c0_28 = arith.constant 0 : index
    %c0_29 = arith.constant 0 : index
    %84 = vector.load %arg6[%c0_28, %c0_29] : memref<128x128xf32, #tpu.memory_space<vmem>>, vector<128x128xf32>
    %c0_30 = arith.constant 0 : index
    %c0_31 = arith.constant 0 : index
    %85 = vector.load %arg7[%c0_30, %c0_31] : memref<1x128xf32, #tpu.memory_space<vmem>>, vector<1x128xf32>
    %cst_32 = arith.constant dense<0.000000e+00> : vector<8x128xf32>
    %86 = tpu.matmul %83, %84, %cst_32 {dimension_numbers = #tpu.dot_dimension_numbers<[1], [0], [0], [1], [0, 0, 1, 1], [], []>} : vector<8x128xf32>, vector<128x128xf32>, vector<8x128xf32> -> vector<8x128xf32>
    %87 = vector.broadcast %85 : vector<1x128xf32> to vector<8x128xf32>
    %88 = arith.addf %86, %87 : vector<8x128xf32>
    %c0_33 = arith.constant 0 : index
    %c0_34 = arith.constant 0 : index
    %89 = vector.load %arg8[%c0_33, %c0_34] : memref<8x128xf32, #tpu.memory_space<vmem>>, vector<8x128xf32>
    tpu.vector_store %arg8[%c0_33, %c0_34], %88 {strides = array<i32>} : memref<8x128xf32, #tpu.memory_space<vmem>>, vector<8x128xf32>,
    return
  }
  func.func @transform_0(%arg0: i32) -> (i32, i32) {
    %c0_i32 = arith.constant 0 : i32
    %c0_i32_0 = arith.constant 0 : i32
    return %arg0, %c0_i32 : i32, i32
  }
  func.func @transform_1(%arg0: i32) -> (i32, i32) {
    %c0_i32 = arith.constant 0 : i32
    %c0_i32_0 = arith.constant 0 : i32
    %c0_i32_1 = arith.constant 0 : i32
    return %c0_i32, %c0_i32_0 : i32, i32
  }
  func.func @transform_2(%arg0: i32) -> (i32, i32) {
    %c0_i32 = arith.constant 0 : i32
    %c0_i32_0 = arith.constant 0 : i32
    %c0_i32_1 = arith.constant 0 : i32
    return %c0_i32, %c0_i32_0 : i32, i32
  }
  func.func @transform_3(%arg0: i32) -> (i32, i32) {
    %c0_i32 = arith.constant 0 : i32
    %c0_i32_0 = arith.constant 0 : i32
    %c0_i32_1 = arith.constant 0 : i32
    return %c0_i32, %c0_i32_0 : i32, i32
  }
  func.func @transform_4(%arg0: i32) -> (i32, i32) {
    %c0_i32 = arith.constant 0 : i32
    %c0_i32_0 = arith.constant 0 : i32
    %c0_i32_1 = arith.constant 0 : i32
    return %c0_i32, %c0_i32_0 : i32, i32
  }
  func.func @transform_5(%arg0: i32) -> (i32, i32) {
    %c0_i32 = arith.constant 0 : i32
    %c0_i32_0 = arith.constant 0 : i32
    %c0_i32_1 = arith.constant 0 : i32
    return %c0_i32, %c0_i32_0 : i32, i32
  }
  func.func @transform_6(%arg0: i32) -> (i32, i32) {
    %c0_i32 = arith.constant 0 : i32
    %c0_i32_0 = arith.constant 0 : i32
    %c0_i32_1 = arith.constant 0 : i32
    return %c0_i32, %c0_i32_0 : i32, i32
  }
  func.func @transform_7(%arg0: i32) -> (i32, i32) {
    %c0_i32 = arith.constant 0 : i32
    %c0_i32_0 = arith.constant 0 : i32
    return %arg0, %c0_i32 : i32, i32
  }
}

module attributes {stable_mosaic.version = 11 : i64} {
  func.func @_fused_head_kernel(%arg0: i32, %arg1: memref<8x128xf32, #tpu.memory_space<vmem>>, %arg2: memref<128x128xf32, #tpu.memory_space<vmem>>, %arg3: memref<3x128xf32, #tpu.memory_space<vmem>>, %arg4: memref<128x128xf32, #tpu.memory_space<vmem>>, %arg5: memref<3x128xf32, #tpu.memory_space<vmem>>, %arg6: memref<128x128xf32, #tpu.memory_space<vmem>>, %arg7: memref<1x128xf32, #tpu.memory_space<vmem>>, %arg8: memref<8x128xf32, #tpu.memory_space<vmem>>) attributes {dimension_semantics = [#tpu.dimension_semantics<parallel>], iteration_bounds = array<i64: 2>, scalar_prefetch = 0 : i64, scratch_operands = 0 : i64, tpu.core_type = #tpu.core_type<tc>, window_params = [{transform_indices = @transform_0, window_bounds = array<i64: 8, 128>}, {pipeline_mode = #tpu.pipeline_mode<synchronous>, transform_indices = @transform_1, window_bounds = array<i64: 128, 128>}, {pipeline_mode = #tpu.pipeline_mode<synchronous>, transform_indices = @transform_2, window_bounds = array<i64: 3, 128>}, {pipeline_mode = #tpu.pipeline_mode<synchronous>, transform_indices = @transform_3, window_bounds = array<i64: 128, 128>}, {pipeline_mode = #tpu.pipeline_mode<synchronous>, transform_indices = @transform_4, window_bounds = array<i64: 3, 128>}, {pipeline_mode = #tpu.pipeline_mode<synchronous>, transform_indices = @transform_5, window_bounds = array<i64: 128, 128>}, {pipeline_mode = #tpu.pipeline_mode<synchronous>, transform_indices = @transform_6, window_bounds = array<i64: 1, 128>}, {transform_indices = @transform_7, window_bounds = array<i64: 8, 128>}]} {
    %0 = tpu.iota {dimensions = array<i32: 1>} : vector<1x128xi32>
    %c96_i32 = arith.constant 96 : i32
    %1 = vector.broadcast %c96_i32 : i32 to vector<1x128xi32>
    %2 = arith.cmpi slt, %0, %1 : vector<1x128xi32>
    %c0 = arith.constant 0 : index
    %c0_0 = arith.constant 0 : index
    %3 = vector.load %arg1[%c0, %c0_0] : memref<8x128xf32, #tpu.memory_space<vmem>>, vector<8x128xf32>
    %c0_1 = arith.constant 0 : index
    %c0_2 = arith.constant 0 : index
    %4 = vector.load %arg2[%c0_1, %c0_2] : memref<128x128xf32, #tpu.memory_space<vmem>>, vector<128x128xf32>
    %c0_3 = arith.constant 0 : index
    %c0_4 = arith.constant 0 : index
    %5 = vector.load %arg3[%c0_3, %c0_4] : memref<3x128xf32, #tpu.memory_space<vmem>>, vector<3x128xf32>
    %6 = vector.extract_strided_slice %5 {offsets = [0, 0], sizes = [1, 128], strides = [1, 1]} : vector<3x128xf32> to vector<1x128xf32>
    %7 = vector.extract_strided_slice %5 {offsets = [1, 0], sizes = [1, 128], strides = [1, 1]} : vector<3x128xf32> to vector<1x128xf32>
    %8 = vector.extract_strided_slice %5 {offsets = [2, 0], sizes = [1, 128], strides = [1, 1]} : vector<3x128xf32> to vector<1x128xf32>
    %cst = arith.constant dense<0.000000e+00> : vector<8x128xf32>
    %9 = tpu.matmul %3, %4, %cst {dimension_numbers = #tpu.dot_dimension_numbers<[1], [0], [0], [1], [0, 0, 1, 1], [], []>} : vector<8x128xf32>, vector<128x128xf32>, vector<8x128xf32> -> vector<8x128xf32>
    %10 = vector.broadcast %6 : vector<1x128xf32> to vector<8x128xf32>
    %11 = arith.addf %9, %10 : vector<8x128xf32>
    %cst_5 = arith.constant dense<0.000000e+00> : vector<8xf32>
    %12 = vector.multi_reduction <add>, %11, %cst_5 [1] : vector<8x128xf32> to vector<8xf32>
    %13 = vector.shape_cast %12 : vector<8xf32> to vector<8x1xf32>
    %cst_6 = arith.constant 0.010416667 : f32
    %14 = vector.broadcast %cst_6 : f32 to vector<8x1xf32>
    %15 = arith.mulf %13, %14 : vector<8x1xf32>
    %16 = vector.broadcast %15 : vector<8x1xf32> to vector<8x128xf32>
    %17 = arith.subf %11, %16 : vector<8x128xf32>
    %cst_7 = arith.constant 0.000000e+00 : f32
    %18 = vector.shape_cast %2 : vector<1x128xi1> to vector<1x128xi1>
    %19 = vector.broadcast %18 : vector<1x128xi1> to vector<8x128xi1>
    %20 = vector.broadcast %cst_7 : f32 to vector<8x128xf32>
    %21 = arith.select %19, %17, %20 : vector<8x128xi1>, vector<8x128xf32>
    %22 = arith.mulf %21, %21 : vector<8x128xf32>
    %cst_8 = arith.constant dense<0.000000e+00> : vector<8xf32>
    %23 = vector.multi_reduction <add>, %22, %cst_8 [1] : vector<8x128xf32> to vector<8xf32>
    %24 = vector.shape_cast %23 : vector<8xf32> to vector<8x1xf32>
    %cst_9 = arith.constant 0.010416667 : f32
    %25 = vector.broadcast %cst_9 : f32 to vector<8x1xf32>
    %26 = arith.mulf %24, %25 : vector<8x1xf32>
    %cst_10 = arith.constant 9.99999974E-6 : f32
    %27 = vector.broadcast %cst_10 : f32 to vector<8x1xf32>
    %28 = arith.addf %26, %27 : vector<8x1xf32>
    %29 = math.rsqrt %28 : vector<8x1xf32>
    %30 = vector.broadcast %29 : vector<8x1xf32> to vector<8x128xf32>
    %31 = arith.mulf %17, %30 : vector<8x128xf32>
    %32 = vector.broadcast %7 : vector<1x128xf32> to vector<8x128xf32>
    %33 = arith.mulf %31, %32 : vector<8x128xf32>
    %34 = vector.broadcast %8 : vector<1x128xf32> to vector<8x128xf32>
    %35 = arith.addf %33, %34 : vector<8x128xf32>
    %cst_11 = arith.constant 5.000000e-01 : f32
    %36 = vector.broadcast %cst_11 : f32 to vector<8x128xf32>
    %37 = arith.mulf %36, %35 : vector<8x128xf32>
    %cst_12 = arith.constant 0.707106769 : f32
    %38 = vector.broadcast %cst_12 : f32 to vector<8x128xf32>
    %39 = arith.mulf %35, %38 : vector<8x128xf32>
    %40 = math.erf %39 : vector<8x128xf32>
    %cst_13 = arith.constant 1.000000e+00 : f32
    %41 = vector.broadcast %cst_13 : f32 to vector<8x128xf32>
    %42 = arith.addf %41, %40 : vector<8x128xf32>
    %43 = arith.mulf %37, %42 : vector<8x128xf32>
    %c0_14 = arith.constant 0 : index
    %c0_15 = arith.constant 0 : index
    %44 = vector.load %arg4[%c0_14, %c0_15] : memref<128x128xf32, #tpu.memory_space<vmem>>, vector<128x128xf32>
    %c0_16 = arith.constant 0 : index
    %c0_17 = arith.constant 0 : index
    %45 = vector.load %arg5[%c0_16, %c0_17] : memref<3x128xf32, #tpu.memory_space<vmem>>, vector<3x128xf32>
    %46 = vector.extract_strided_slice %45 {offsets = [0, 0], sizes = [1, 128], strides = [1, 1]} : vector<3x128xf32> to vector<1x128xf32>
    %47 = vector.extract_strided_slice %45 {offsets = [1, 0], sizes = [1, 128], strides = [1, 1]} : vector<3x128xf32> to vector<1x128xf32>
    %48 = vector.extract_strided_slice %45 {offsets = [2, 0], sizes = [1, 128], strides = [1, 1]} : vector<3x128xf32> to vector<1x128xf32>
    %cst_18 = arith.constant dense<0.000000e+00> : vector<8x128xf32>
    %49 = tpu.matmul %43, %44, %cst_18 {dimension_numbers = #tpu.dot_dimension_numbers<[1], [0], [0], [1], [0, 0, 1, 1], [], []>} : vector<8x128xf32>, vector<128x128xf32>, vector<8x128xf32> -> vector<8x128xf32>
    %50 = vector.broadcast %46 : vector<1x128xf32> to vector<8x128xf32>
    %51 = arith.addf %49, %50 : vector<8x128xf32>
    %cst_19 = arith.constant dense<0.000000e+00> : vector<8xf32>
    %52 = vector.multi_reduction <add>, %51, %cst_19 [1] : vector<8x128xf32> to vector<8xf32>
    %53 = vector.shape_cast %52 : vector<8xf32> to vector<8x1xf32>
    %cst_20 = arith.constant 0.010416667 : f32
    %54 = vector.broadcast %cst_20 : f32 to vector<8x1xf32>
    %55 = arith.mulf %53, %54 : vector<8x1xf32>
    %56 = vector.broadcast %55 : vector<8x1xf32> to vector<8x128xf32>
    %57 = arith.subf %51, %56 : vector<8x128xf32>
    %cst_21 = arith.constant 0.000000e+00 : f32
    %58 = vector.shape_cast %2 : vector<1x128xi1> to vector<1x128xi1>
    %59 = vector.broadcast %58 : vector<1x128xi1> to vector<8x128xi1>
    %60 = vector.broadcast %cst_21 : f32 to vector<8x128xf32>
    %61 = arith.select %59, %57, %60 : vector<8x128xi1>, vector<8x128xf32>
    %62 = arith.mulf %61, %61 : vector<8x128xf32>
    %cst_22 = arith.constant dense<0.000000e+00> : vector<8xf32>
    %63 = vector.multi_reduction <add>, %62, %cst_22 [1] : vector<8x128xf32> to vector<8xf32>
    %64 = vector.shape_cast %63 : vector<8xf32> to vector<8x1xf32>
    %cst_23 = arith.constant 0.010416667 : f32
    %65 = vector.broadcast %cst_23 : f32 to vector<8x1xf32>
    %66 = arith.mulf %64, %65 : vector<8x1xf32>
    %cst_24 = arith.constant 9.99999974E-6 : f32
    %67 = vector.broadcast %cst_24 : f32 to vector<8x1xf32>
    %68 = arith.addf %66, %67 : vector<8x1xf32>
    %69 = math.rsqrt %68 : vector<8x1xf32>
    %70 = vector.broadcast %69 : vector<8x1xf32> to vector<8x128xf32>
    %71 = arith.mulf %57, %70 : vector<8x128xf32>
    %72 = vector.broadcast %47 : vector<1x128xf32> to vector<8x128xf32>
    %73 = arith.mulf %71, %72 : vector<8x128xf32>
    %74 = vector.broadcast %48 : vector<1x128xf32> to vector<8x128xf32>
    %75 = arith.addf %73, %74 : vector<8x128xf32>
    %cst_25 = arith.constant 5.000000e-01 : f32
    %76 = vector.broadcast %cst_25 : f32 to vector<8x128xf32>
    %77 = arith.mulf %76, %75 : vector<8x128xf32>
    %cst_26 = arith.constant 0.707106769 : f32
    %78 = vector.broadcast %cst_26 : f32 to vector<8x128xf32>
    %79 = arith.mulf %75, %78 : vector<8x128xf32>
    %80 = math.erf %79 : vector<8x128xf32>
    %cst_27 = arith.constant 1.000000e+00 : f32
    %81 = vector.broadcast %cst_27 : f32 to vector<8x128xf32>
    %82 = arith.addf %81, %80 : vector<8x128xf32>
    %83 = arith.mulf %77, %82 : vector<8x128xf32>
    %c0_28 = arith.constant 0 : index
    %c0_29 = arith.constant 0 : index
    %84 = vector.load %arg6[%c0_28, %c0_29] : memref<128x128xf32, #tpu.memory_space<vmem>>, vector<128x128xf32>
    %c0_30 = arith.constant 0 : index
    %c0_31 = arith.constant 0 : index
    %85 = vector.load %arg7[%c0_30, %c0_31] : memref<1x128xf32, #tpu.memory_space<vmem>>, vector<1x128xf32>
    %cst_32 = arith.constant dense<0.000000e+00> : vector<8x128xf32>
    %86 = tpu.matmul %83, %84, %cst_32 {dimension_numbers = #tpu.dot_dimension_numbers<[1], [0], [0], [1], [0, 0, 1, 1], [], []>} : vector<8x128xf32>, vector<128x128xf32>, vector<8x128xf32> -> vector<8x128xf32>
    %87 = vector.broadcast %85 : vector<1x128xf32> to vector<8x128xf32>
    %88 = arith.addf %86, %87 : vector<8x128xf32>
    %c0_33 = arith.constant 0 : index
    %c0_34 = arith.constant 0 : index
    %89 = vector.load %arg8[%c0_33, %c0_34] : memref<8x128xf32, #tpu.memory_space<vmem>>, vector<8x128xf32>
    tpu.vector_store %arg8[%c0_33, %c0_34], %88 {strides = array<i32>} : memref<8x128xf32, #tpu.memory_space<vmem>>, vector<8x128xf32>,
    return
  }
  func.func @transform_0(%arg0: i32) -> (i32, i32) {
    %c0_i32 = arith.constant 0 : i32
    %c0_i32_0 = arith.constant 0 : i32
    return %arg0, %c0_i32 : i32, i32
  }
  func.func @transform_1(%arg0: i32) -> (i32, i32) {
    %c0_i32 = arith.constant 0 : i32
    %c0_i32_0 = arith.constant 0 : i32
    %c0_i32_1 = arith.constant 0 : i32
    return %c0_i32, %c0_i32_0 : i32, i32
  }
  func.func @transform_2(%arg0: i32) -> (i32, i32) {
    %c0_i32 = arith.constant 0 : i32
    %c0_i32_0 = arith.constant 0 : i32
    %c0_i32_1 = arith.constant 0 : i32
    return %c0_i32, %c0_i32_0 : i32, i32
  }
  func.func @transform_3(%arg0: i32) -> (i32, i32) {
    %c0_i32 = arith.constant 0 : i32
    %c0_i32_0 = arith.constant 0 : i32
    %c0_i32_1 = arith.constant 0 : i32
    return %c0_i32, %c0_i32_0 : i32, i32
  }
  func.func @transform_4(%arg0: i32) -> (i32, i32) {
    %c0_i32 = arith.constant 0 : i32
    %c0_i32_0 = arith.constant 0 : i32
    %c0_i32_1 = arith.constant 0 : i32
    return %c0_i32, %c0_i32_0 : i32, i32
  }
  func.func @transform_5(%arg0: i32) -> (i32, i32) {
    %c0_i32 = arith.constant 0 : i32
    %c0_i32_0 = arith.constant 0 : i32
    %c0_i32_1 = arith.constant 0 : i32
    return %c0_i32, %c0_i32_0 : i32, i32
  }
  func.func @transform_6(%arg0: i32) -> (i32, i32) {
    %c0_i32 = arith.constant 0 : i32
    %c0_i32_0 = arith.constant 0 : i32
    %c0_i32_1 = arith.constant 0 : i32
    return %c0_i32, %c0_i32_0 : i32, i32
  }
  func.func @transform_7(%arg0: i32) -> (i32, i32) {
    %c0_i32 = arith.constant 0 : i32
    %c0_i32_0 = arith.constant 0 : i32
    return %arg0, %c0_i32 : i32, i32
  }
}

</mosaic_0001>

<bundles_post_ra>
// kernel: tpu_custom_call.1
= control target key start
LH: loop header
LB: loop body
LE: loop exit
PB: predicated region body
PF: predicated region fallthrough
CT: control target
= control target key end

     0   :  { %s1659_s0 = inlined_call_operand.hbm [shape: f32[16,128], index: 0, kind: input, shape index: {}]   ;;  %s1660_s1 = inlined_call_operand.hbm [shape: f32[128,128], index: 1, kind: input, shape index: {}]   ;;  %s1661_s2 = inlined_call_operand.hbm [shape: f32[3,128], index: 2, kind: input, shape index: {}]   ;;  %s1662_s3 = inlined_call_operand.hbm [shape: f32[128,128], index: 3, kind: input, shape index: {}]   ;;  %s1663_s4 = inlined_call_operand.vmem [shape: f32[3,128], index: 4, kind: input, shape index: {}]   ;;  %s1664_s5 = inlined_call_operand.hbm [shape: f32[128,128], index: 5, kind: input, shape index: {}]   ;;  %s1665_s6 = inlined_call_operand.vmem [shape: f32[1,128], index: 6, kind: input, shape index: {}]   ;;  %s1666_s7 = inlined_call_operand.hbm [shape: f32[16,128], index: 7, kind: output, shape index: {}]  }
   0x1   :  { %1671 = sst [smem:[#allocation16_spill]] %s1660_s1 }
   0x2   :  { %1672 = sst [smem:[#allocation17_spill]] %s1661_s2 }
   0x3   :  { %12 = vsyncpa [#allocation3], 0 }
   0x4   :  { %14 = vsyncpa [#allocation3 + $0x1], 0 }
   0x5   :  { %15 = vsyncpa [#allocation6], 0 }
   0x6   :  { %16 = vsyncpa [#allocation9], 0 }
   0x7   :  { %17 = vsyncpa [#allocation4], 0 }
   0x8   :  { %19 = vsyncpa [#allocation4 + $0x1], 0  ;;  %s1340_s24 = smov 0   ;;  %s1342_s25 = smov 0  }
   0x9   :  { %s1344_s26 = smov 0   ;;  %s1346_s27 = smov 0  }
   0xa LB: > { %s1290_s28 = smov [#allocation5]   ;;  %s1361_s30 = sadd.s32 4294967295, %s1288_s27   ;;  %s1288_s27 = sphi %s1346_s27, %s1694_s27   ;;  %s1284_s26 = sphi %s1344_s26, %s1693_s26   ;;  %s1280_s25 = sphi %s1342_s25, %s1692_s25   ;;  %s1276_s24 = sphi %s1340_s24, %s1691_s24  }
   0xb   : > { %s220_s29 = sshll.u32 %s1290_s28, 4  ;;  %p809_p0 = scmp.ge.s32.totalorder %s1288_s27, 1  ;;  %s221_s29 = int_to_ptr.vmem [resolvable:$true] %s220_s29 }
   0xc   : > { %p1667_p1 = scmp.eq.s32.totalorder %s1361_s30, 0  ;;  %p208_p2 = scmp.lt.s32.totalorder %s1288_s27, 3 }
   0xd   : > { %s1291_s9 = smov [#allocation8]   ;;  %s1292_s12 = smov [#allocation7]  }
   0xe   : > { %p1366_p3 = pnand %p809_p0, %p208_p2  ;;  %s244_s10 = sshll.u32 %s1291_s9, 4  ;;  %s1379_s10 = int_to_ptr.vmem [resolvable:$true] %s244_s10 }
   0xf   : > { %s234_s13 = sshll.u32 %s1292_s12, 4  ;;  %s1095_s14 = scalar_lea.vmem %s221_s29, 2048  ;;  %s1381_s13 = int_to_ptr.vmem [resolvable:$true] %s234_s13 }
  0x10   : > { %s1673_s8 = scalar_select %p1366_p3, 1, 0 }
  0x11   : > { %p1005_p5 = pneg %p1366_p3  ;;  %p1096_p8 = scmp.ne.s32.totalorder %s221_s29, %s1095_s14 }
  0x12   : > { %p1103_p11 = scmp.lt.s32.totalorder %s221_s29, %s221_s29  ;;  %p1104_p12 = scmp.lt.s32.totalorder %s1095_s14, %s1095_s14 }
  0x13   : > { %p1375_p6 = pnand %p1005_p5, %p1667_p1 }
  0x14   : > { %p1105_p13 = por %p1104_p12, %p1103_p11 }
  0x15   : > { %p1086_p7 = pneg %p1375_p6 }
  0x17   : > { %p1098_p9 = pnand %p1096_p8, %p1086_p7 }
  0x19   : > { %p1099_p10 = pneg %p1098_p9 }
  0x1b   : > { %p1106_p0 = pnand %p1105_p13, %p1099_p10 }
  0x1d   : > { %1109 = shalt.err (!%p1106_p0)
}
  0x1e   : > { %s1293_s15 = smov 128   ;;  %s1294_s16 = smov 8  }
  0x1f   : > { %s1675_s1 = sld [smem:[#allocation16_spill]]  ;;  %s1121_s19 = scalar_lea.vmem %s1379_s10, 2048 }
  0x20   : > { %p1122_p2 = scmp.ne.s32.totalorder %s1379_s10, %s1121_s19  ;;  %p1129_p9 = scmp.lt.s32.totalorder %s1379_s10, %s1379_s10 }
  0x21   : > { %p1130_p10 = scmp.lt.s32.totalorder %s1121_s19, %s1121_s19 }
  0x22   : > { %p1124_p5 = pnand %p1122_p2, %p1086_p7 }
  0x23   : > { %p1131_p11 = por %p1130_p10, %p1129_p9 }
  0x24   : > { %p1125_p8 = pneg %p1124_p5 }
  0x25   : > { %1008 = dma.hbm_to_vmem [thread:$0]  (!%p1375_p6), %s1675_s1, 2048, %s221_s29, [#allocation6], %s1293_s15, %s1293_s15, %s1294_s16  }
  0x26   : > { %p1132_p12 = pnand %p1131_p11, %p1125_p8 }
  0x28   : > { %1135 = shalt.err (!%p1132_p12)
}
  0x29   : > { %1014 = dma.hbm_to_vmem [thread:$0]  (!%p1375_p6), %s1662_s3, 2048, %s1379_s10, [#allocation9], %s1293_s15, %s1293_s15, %s1294_s16  }
  0x2a   : > { %s1147_s22 = scalar_lea.vmem %s1381_s13, 64  ;;  %p1155_p5 = scmp.lt.s32.totalorder %s1381_s13, %s1381_s13 }
  0x2b   : > { %p1148_p13 = scmp.ne.s32.totalorder %s1381_s13, %s1147_s22  ;;  %p1156_p8 = scmp.lt.s32.totalorder %s1147_s22, %s1147_s22 }
  0x2d   : > { %p1150_p0 = pnand %p1148_p13, %p1086_p7  ;;  %p1157_p9 = por %p1156_p8, %p1155_p5 }
  0x2f   : > { %p1151_p2 = pneg %p1150_p0 }
  0x31   : > { %p1158_p10 = pnand %p1157_p9, %p1151_p2 }
  0x33   : > { %1161 = shalt.err (!%p1158_p10)
}
  0x34   : > { %s1676_s2 = sld [smem:[#allocation17_spill]]  ;;  %s1295_s29 = smov [#allocation10]  }
  0x35   : > { %s260_s9 = sshll.u32 %s1295_s29, 4  ;;  %s261_s9 = int_to_ptr.vmem [resolvable:$true] %s260_s9 }
  0x36   : > { %s1173_s10 = scalar_lea.vmem %s261_s9, 2048  ;;  %p1181_p0 = scmp.lt.s32.totalorder %s261_s9, %s261_s9 }
  0x37   : > { %p1174_p11 = scmp.ne.s32.totalorder %s261_s9, %s1173_s10  ;;  %p1182_p2 = scmp.lt.s32.totalorder %s1173_s10, %s1173_s10 }
  0x39   : > { %p1176_p12 = pnand %p1174_p11, %p1086_p7  ;;  %p1183_p5 = por %p1182_p2, %p1181_p0 }
  0x3a   : > { %1011 = dma.hbm_to_vmem [thread:$0]  (!%p1375_p6), %s1676_s2, 64, %s1381_s13, [#allocation6]  }
  0x3b   : > { %p1177_p13 = pneg %p1176_p12 }
  0x3d   : > { %p1184_p8 = pnand %p1183_p5, %p1177_p13 }
  0x3f   : > { %1187 = shalt.err (!%p1184_p8)
}
  0x40   : > { %1017 = dma.hbm_to_vmem [thread:$0]  (!%p1375_p6), %s1664_s5, 2048, %s261_s9, [#allocation9], %s1293_s15, %s1293_s15, %s1294_s16  }
  0x41   : > { %s808_s11 = sadd.s32 4294967294, %s1288_s27   ;;  %s1438_s14 = sadd.s32 1, %s1288_s27  }
  0x42   : > { %s29_s17 = ssub.s32 %s1288_s27, %s1438_s14  ;;  %s32_s18 = sadd.s32 1, %s1284_s26 }
  0x43   : > { %p30_p7 = scmp.eq.s32.totalorder %s29_s17, 0  ;;  %p39_p9 = scmp.ne.s32.totalorder %s1284_s26, %s1280_s25 }
  0x44   : > { %p40_p10 = scmp.eq.s32.totalorder %s1288_s27, 0  ;;  %p45_p11 = scmp.ne.s32.totalorder %s1280_s25, %s1276_s24 }
  0x45   : > { %s1449_s19 = scalar_select %p30_p7, %s1284_s26, %s32_s18  }
  0x46   : > { %p1451_p12 = por %p40_p10, %p39_p9  ;;  %p1457_p6 = por %p1667_p1, %p45_p11 }
  0x47   : > { %p195_p13 = scmp.eq.s32.totalorder %s1361_s30, 1  ;;  %p201_p0 = scmp.eq.s32.totalorder %s808_s11, 1 }
  0x48   : > { %s1678_s15 = scalar_select %p1457_p6, 1, 0 }
  0x49   : > { %p1030_p2 = scmp.lt.s32.totalorder %s1288_s27, 2  ;;  %s277_s16 = sand.u32 1, %s1284_s26  }
  0x4a   : > { %p1464_p5 = por %p195_p13, %p39_p9  ;;  %p1468_p8 = por %p201_p0, %p45_p11 }
  0x4b   : > { %s815_s23 = sshll.u32 %s277_s16, 3  ;;  %s816_s28 = sshll.u32 %s1288_s27, 7 }
  0x4c   : > { %s1679_s21 = scalar_select %p1464_p5, 1, 0 }
  0x4d   : > { %s1680_s22 = scalar_select %p1468_p8, 1, 0 }
  0x4e   : > { %s1476_s10 = scalar_lea.hbm %s1659_s0, %s816_s28  ;;  %s281_s12 = scalar_lea.vmem [#allocation2], %s815_s23 }
  0x4f   : > { %s288_s13 = sshll.u32 %s281_s12, 4  ;;  %p1480_p7 = pnand %p1030_p2, %p1451_p12  ;;  %s289_s13 = int_to_ptr.vmem [resolvable:$true] %s288_s13 }
  0x50   : > { %s278_s17 = scalar_lea.sflag [#allocation3], %s277_s16  ;;  %s1188_s18 = scalar_lea.hbm %s1476_s10, 128 }
  0x51   : > { %p1189_p9 = scmp.ne.s32.totalorder %s1476_s10, %s1188_s18  ;;  %p1190_p10 = pneg %p1480_p7 }
  0x52   : > { %s1193_s9 = scalar_lea.hbm %s1659_s0, 256  ;;  %p1194_p0 = scmp.lt.s32.totalorder %s1476_s10, %s1659_s0 }
  0x53   : > { %p1191_p11 = pnand %p1190_p10, %p1189_p9  ;;  %p1195_p12 = scmp.lt.s32.totalorder %s1193_s9, %s1188_s18 }
  0x55   : > { %p1192_p13 = pneg %p1191_p11  ;;  %p1196_p2 = por %p1195_p12, %p1194_p0 }
  0x57   : > { %p1197_p4 = pnand %p1196_p2, %p1192_p13 }
  0x59   : > { %1200 = shalt.err (!%p1197_p4)
}
  0x5a   : > { %s1201_s20 = scalar_lea.vmem %s289_s13, 128  ;;  %s1296_s16 = smov [#allocation2]  }
  0x5b   : > { %p1202_p1 = scmp.ne.s32.totalorder %s289_s13, %s1201_s20  ;;  %s1206_s1 = sshll.u32 %s1296_s16, 4  ;;  %s1207_s1 = int_to_ptr.vmem [resolvable:$false] %s1206_s1 }
  0x5c   : > { %s1208_s2 = scalar_lea.vmem %s1207_s1, 256  ;;  %p1209_p9 = scmp.lt.s32.totalorder %s289_s13, %s1207_s1 }
  0x5d   : > { %p1204_p8 = pnand %p1202_p1, %p1190_p10  ;;  %p1210_p11 = scmp.lt.s32.totalorder %s1208_s2, %s1201_s20 }
  0x5f   : > { %p1205_p5 = pneg %p1204_p8  ;;  %p1211_p6 = por %p1210_p11, %p1209_p9 }
  0x61   : > { %p1212_p3 = pnand %p1211_p6, %p1205_p5 }
  0x63   : > { %1215 = shalt.err (!%p1212_p3)
}
  0x64   : > { %1021 = dma.hbm_to_vmem [thread:$0]  (!%p1480_p7), %s1476_s10, 128, %s289_s13, %s278_s17  }
  0x65   : > { %p1682_p13 = scmp.ne.s32.totalorder %s1673_s8, 0 }
  0x66   : > { %s1501_s18 = sand.u32 (!%p1682_p13), 1, %s1280_s25   ;;  %p1683_p1 = scmp.ne.s32.totalorder (!%p1682_p13), %s1678_s15, 0 }
  0x67   : > { %297 = sbr.rel (%p1682_p13) target bundleno = 1401 (0x579), region = 48  ;;  %s818_s28 = sshll.u32 (!%p1682_p13), %s1501_s18, 3 }
  0x68   : > { %s300_s1 = scalar_lea.sflag (!%p1682_p13), [#allocation3], %s1501_s18  ;;  %s1507_s2 = scalar_lea.vmem (!%p1682_p13), [#allocation2], %s818_s28 }
  0x6c   : > { %1259 = dma.done.wait (%p1683_p1), %s300_s1, 128  }
  0x6d   : > { %1261 = vsyncadd (%p1683_p1), %s300_s1, 4294967168  ;;  %p1684_p3 = scmp.eq.s32.totalorder %s1361_s30, 0 }
  0x6f   : > { %1263 = dma.done.wait (%p1684_p3), [#allocation6], 2112   ;;  %p1685_p4 = pmov %p1684_p3 }
  0x70   : > { %p1686_p6 = pmov %p1684_p3 }
  0x71   : > { %1265 = vsyncadd (%p1685_p4), [#allocation6], 4294965184 }
  0x72   : > { %1267 = dma.done.wait (%p1686_p6), [#allocation9], 4096   ;;  %p1687_p5 = pmov %p1684_p3 }
  0x73   : > { %v1297_v0 = vmov 0.0   ;;  %vm1298_vm0 = vmmov 0   ;;  %v369_v1 = vld [vmem:[#allocation5 + $0x78] sm:$0xff]  ;;  %v368_v2 = vld [vmem:[#allocation5 + $0x70] sm:$0xff]  ;;  %v367_v3 = vld [vmem:[#allocation5 + $0x68] sm:$0xff]  ;;  %v350_v18 = vlaneseq  ;;  %s826_s11 = sshll.u32 %s1361_s30, 7 }
  0x74   : > { %1269 = vsyncadd (%p1687_p5), [#allocation9], 4294963200  ;;  %880 = vmatprep.subr.mxu0 %v1297_v0  ;;  %912 = vmatprep.mubr.msk.f32.mxu0 %vm1298_vm0, %v1297_v0  ;;  %v366_v4 = vld [vmem:[#allocation5 + $0x60] sm:$0xff]  ;;  %v365_v5 = vld [vmem:[#allocation5 + $0x58] sm:$0xff]  ;;  %s349_s17 = scalar_lea.vmem [#allocation11], %s818_s28  ;;  %s1622_s12 = scalar_lea.hbm %s1666_s7, %s826_s11 }
  0x75   : > { %915 = vmatprep.subr.mxu1 %v1297_v0  ;;  %947 = vmatprep.mubr.msk.f32.mxu1 %vm1298_vm0, %v1297_v0  ;;  %v364_v6 = vld [vmem:[#allocation5 + $0x50] sm:$0xff]  ;;  %v363_v7 = vld [vmem:[#allocation5 + $0x48] sm:$0xff]  ;;  %v362_v8 = vld [vmem:[#allocation5 + $0x40] sm:$0xff]  ;;  %v1546_v19 = vshrl.u32 %v350_v18, 7  ;;  %v1554_v26 = vand.u32 127, %v350_v18  ;;  %s700_s29 = sshll.u32 %s349_s17, 4  ;;  %s701_s29 = int_to_ptr.vmem [resolvable:$true] %s700_s29 }
  0x76   : > { %881 = vmatpush3.msra.mxu0 %v369_v1  ;;  %v361_v9 = vld [vmem:[#allocation5 + $0x38] sm:$0xff]  ;;  %v360_v10 = vld [vmem:[#allocation5 + $0x30] sm:$0xff]  ;;  %v359_v11 = vld [vmem:[#allocation5 + $0x28] sm:$0xff]  ;;  %s687_s20 = scalar_lea.sflag [#allocation4], %s1501_s18  ;;  %s1216_s16 = scalar_lea.vmem %s701_s29, 128 }
  0x77   : > { %882 = vmatprep.subr.mxu0 %v1297_v0  ;;  %v358_v12 = vld [vmem:[#allocation5 + $0x20] sm:$0xff]  ;;  %v357_v13 = vld [vmem:[#allocation5 + $0x18] sm:$0xff]  ;;  %v356_v14 = vld [vmem:[#allocation5 + $0x10] sm:$0xff]  ;;  %v373_v20 = vsub.s32 0, %v1546_v19  ;;  %vm352_vm1 = vcmp.lt.s32.totalorder %v1554_v26, 96  ;;  %v461_v51 = vsub.s32 1, %v1546_v19  ;;  %p1217_p8 = scmp.ne.s32.totalorder %s701_s29, %s1216_s16 }
  0x78   : > { %883 = vmatpush3.msra.mxu0 %v368_v2  ;;  %v355_v15 = vld [vmem:[#allocation5 + $0x8] sm:$0xff]  ;;  %v354_v16 = vld [vmem:[#allocation5] sm:$0xff]  ;;  %v353_v17 = vld [vmem:[%s1507_s2] sm:$0xff]  ;;  %v466_v52 = vsub.s32 2, %v1546_v19  ;;  %p1688_p7 = scmp.ne.s32.totalorder %s1679_s21, 0  ;;  %s1299_s30 = smov [#allocation11]  }
  0x79   : > { %884 = vmatprep.subr.mxu0 %v1297_v0  ;;  %v1549_v21 = vld [vmem:[#allocation7] sm:$0x7]  ;;  %v488_v33 = vld [vmem:[#allocation8 + $0x70] sm:$0xff]  ;;  %v487_v34 = vld [vmem:[#allocation8 + $0x68] sm:$0xff]  ;;  %s1220_s1 = sshll.u32 %s1299_s30, 4  ;;  %s1221_s1 = int_to_ptr.vmem [resolvable:$false] %s1220_s1 }
  0x7a   : > { %885 = vmatpush3.msra.mxu0 %v367_v3  ;;  %v374_v22 = vrot.slane %v1549_v21, %v373_v20  ;;  %v489_v32 = vld [vmem:[#allocation8 + $0x78] sm:$0xff]  ;;  %v486_v35 = vld [vmem:[#allocation8 + $0x60] sm:$0xff]  ;;  %v484_v37 = vld [vmem:[#allocation8 + $0x50] sm:$0xff]  ;;  %v462_v53 = vrot.slane %v1549_v21, %v461_v51  ;;  %v467_v55 = vrot.slane %v1549_v21, %v466_v52  ;;  %p1218_p10 = pnand %p1217_p8, %p1688_p7  ;;  %s1222_s28 = scalar_lea.vmem %s1221_s1, 256 }
  0x7b   : > { %886 = vmatprep.subr.mxu0 %v1297_v0  ;;  %916 = vmatpush3.msra.mxu1 %v489_v32  ;;  %v485_v36 = vld [vmem:[#allocation8 + $0x58] sm:$0xff]  ;;  %v483_v38 = vld [vmem:[#allocation8 + $0x48] sm:$0xff]  ;;  %v482_v39 = vld [vmem:[#allocation8 + $0x40] sm:$0xff]  ;;  %p1223_p12 = scmp.lt.s32.totalorder %s701_s29, %s1221_s1  ;;  %p1224_p2 = scmp.lt.s32.totalorder %s1222_s28, %s1216_s16 }
  0x7c   : > { %887 = vmatpush3.msra.mxu0 %v366_v4  ;;  %917 = vmatprep.subr.mxu1 %v1297_v0  ;;  %v481_v40 = vld [vmem:[#allocation8 + $0x38] sm:$0xff]  ;;  %v480_v41 = vld [vmem:[#allocation8 + $0x30] sm:$0xff]  ;;  %v479_v42 = vld [vmem:[#allocation8 + $0x28] sm:$0xff]  ;;  %p1219_p0 = pneg %p1218_p10 }
  0x7d   : > { %888 = vmatprep.subr.mxu0 %v1297_v0  ;;  %918 = vmatpush3.msra.mxu1 %v488_v33  ;;  %v478_v43 = vld [vmem:[#allocation8 + $0x20] sm:$0xff]  ;;  %v477_v44 = vld [vmem:[#allocation8 + $0x18] sm:$0xff]  ;;  %v476_v45 = vld [vmem:[#allocation8 + $0x10] sm:$0xff]  ;;  %p1225_p9 = por %p1224_p2, %p1223_p12 }
  0x7e   : > { %889 = vmatpush3.msra.mxu0 %v365_v5  ;;  %919 = vmatprep.subr.mxu1 %v1297_v0  ;;  %v475_v46 = vld [vmem:[#allocation8 + $0x8] sm:$0xff]  ;;  %v474_v47 = vld [vmem:[#allocation8] sm:$0xff]  ;;  %v598_v21 = vld [vmem:[#allocation10 + $0x30] sm:$0xff] }
  0x7f   : > { %890 = vmatprep.subr.mxu0 %v1297_v0  ;;  %920 = vmatpush3.msra.mxu1 %v487_v34  ;;  %v1585_v1 = vld [vmem:[%s1663_s4] sm:$0x7]  ;;  %v600_v18 = vld [vmem:[#allocation10 + $0x40] sm:$0xff]  ;;  %p1226_p11 = pnand %p1225_p9, %p1219_p0 }
  0x80   : > { %891 = vmatpush3.msra.mxu0 %v364_v6  ;;  %921 = vmatprep.subr.mxu1 %v1297_v0  ;;  %v494_v2 = vrot.slane %v1585_v1, %v373_v20  ;;  %v599_v20 = vld [vmem:[#allocation10 + $0x38] sm:$0xff]  ;;  %v593_v26 = vld [vmem:[#allocation10 + $0x8] sm:$0xff]  ;;  %v585_v33 = vrot.slane %v1585_v1, %v466_v52 }
  0x81   : > { %892 = vmatprep.subr.mxu0 %v1297_v0  ;;  %922 = vmatpush3.msra.mxu1 %v486_v35 }
  0x82   : > { %893 = vmatpush3.msra.mxu0 %v363_v7  ;;  %923 = vmatprep.subr.mxu1 %v1297_v0 }
  0x83   : > { %894 = vmatprep.subr.mxu0 %v1297_v0  ;;  %924 = vmatpush3.msra.mxu1 %v485_v36 }
  0x84   : > { %895 = vmatpush3.msra.mxu0 %v362_v8  ;;  %925 = vmatprep.subr.mxu1 %v1297_v0 }
  0x85   : > { %896 = vmatprep.subr.mxu0 %v1297_v0  ;;  %926 = vmatpush3.msra.mxu1 %v484_v37 }
  0x86   : > { %897 = vmatpush3.msra.mxu0 %v361_v9  ;;  %927 = vmatprep.subr.mxu1 %v1297_v0 }
  0x87   : > { %898 = vmatprep.subr.mxu0 %v1297_v0  ;;  %928 = vmatpush3.msra.mxu1 %v483_v38 }
  0x88   : > { %899 = vmatpush3.msra.mxu0 %v360_v10  ;;  %929 = vmatprep.subr.mxu1 %v1297_v0 }
  0x89   : > { %900 = vmatprep.subr.mxu0 %v1297_v0  ;;  %930 = vmatpush3.msra.mxu1 %v482_v39 }
  0x8a   : > { %901 = vmatpush3.msra.mxu0 %v359_v11  ;;  %931 = vmatprep.subr.mxu1 %v1297_v0  ;;  %v607_v11 = vld [vmem:[#allocation10 + $0x78] sm:$0xff] }
  0x8b   : > { %902 = vmatprep.subr.mxu0 %v1297_v0  ;;  %932 = vmatpush3.msra.mxu1 %v481_v40 }
  0x8c   : > { %903 = vmatpush3.msra.mxu0 %v358_v12  ;;  %933 = vmatprep.subr.mxu1 %v1297_v0  ;;  %v606_v12 = vld [vmem:[#allocation10 + $0x70] sm:$0xff] }
  0x8d   : > { %904 = vmatprep.subr.mxu0 %v1297_v0  ;;  %934 = vmatpush3.msra.mxu1 %v480_v41  ;;  %v824_v41 = vld [vmem:[%s1665_s6] ss:$0 sm:$0xff] }
  0x8e   : > { %905 = vmatpush3.msra.mxu0 %v357_v13  ;;  %935 = vmatprep.subr.mxu1 %v1297_v0  ;;  %v605_v13 = vld [vmem:[#allocation10 + $0x68] sm:$0xff] }
  0x8f   : > { %906 = vmatprep.subr.mxu0 %v1297_v0  ;;  %936 = vmatpush3.msra.mxu1 %v479_v42 }
  0x90   : > { %907 = vmatpush3.msra.mxu0 %v356_v14  ;;  %937 = vmatprep.subr.mxu1 %v1297_v0  ;;  %v604_v14 = vld [vmem:[#allocation10 + $0x60] sm:$0xff] }
  0x91   : > { %908 = vmatprep.subr.mxu0 %v1297_v0  ;;  %938 = vmatpush3.msra.mxu1 %v478_v43 }
  0x92   : > { %909 = vmatpush3.msra.mxu0 %v355_v15  ;;  %939 = vmatprep.subr.mxu1 %v1297_v0  ;;  %v603_v15 = vld [vmem:[#allocation10 + $0x58] sm:$0xff] }
  0x93   : > { %910 = vmatprep.subr.mxu0 %v1297_v0  ;;  %940 = vmatpush3.msra.mxu1 %v477_v44 }
  0x94   : > { %911 = vmatpush3.msra.mxu0 %v354_v16  ;;  %941 = vmatprep.subr.mxu1 %v1297_v0  ;;  %v602_v16 = vld [vmem:[#allocation10 + $0x50] sm:$0xff] }
  0x95   : > { %913 = vmatmul.mubr.f32.vlgmr.msra.gmra.mxu0 %v353_v17  ;;  %950 = vmatprep.subr.mxu0 %v1297_v0  ;;  %v601_v17 = vld [vmem:[#allocation10 + $0x48] sm:$0xff] }
  0x96   : > { %982 = vmatprep.mubr.msk.f32.mxu0 %vm1298_vm0, %v1297_v0  ;;  %942 = vmatpush3.msra.mxu1 %v476_v45 }
  0x97   : > { %943 = vmatprep.subr.mxu1 %v1297_v0  ;;  %951 = vmatpush3.msra.mxu0 %v607_v11 }
  0x98   : > { %944 = vmatpush3.msra.mxu1 %v475_v46  ;;  %952 = vmatprep.subr.mxu0 %v1297_v0 }
  0x99   : > { %945 = vmatprep.subr.mxu1 %v1297_v0  ;;  %953 = vmatpush3.msra.mxu0 %v606_v12 }
  0x9a   : > { %946 = vmatpush3.msra.mxu1 %v474_v47  ;;  %954 = vmatprep.subr.mxu0 %v1297_v0 }
  0x9b   : > { %955 = vmatpush3.msra.mxu0 %v605_v13 }
  0x9c   : > { %956 = vmatprep.subr.mxu0 %v1297_v0 }
  0x9d   : > { %957 = vmatpush3.msra.mxu0 %v604_v14 }
  0x9e   : > { %958 = vmatprep.subr.mxu0 %v1297_v0 }
  0x9f   : > { %959 = vmatpush3.msra.mxu0 %v603_v15 }
  0xa0   : > { %960 = vmatprep.subr.mxu0 %v1297_v0 }
  0xa1   : > { %961 = vmatpush3.msra.mxu0 %v602_v16 }
  0xa2   : > { %962 = vmatprep.subr.mxu0 %v1297_v0 }
  0xa3   : > { %963 = vmatpush3.msra.mxu0 %v601_v17 }
  0xa4   : > { %964 = vmatprep.subr.mxu0 %v1297_v0 }
  0xa5   : > { %965 = vmatpush3.msra.mxu0 %v600_v18 }
  0xa6   : > { %966 = vmatprep.subr.mxu0 %v1297_v0 }
  0xa7   : > { %967 = vmatpush3.msra.mxu0 %v599_v20 }
  0xa8   : > { %968 = vmatprep.subr.mxu0 %v1297_v0 }
  0xa9   : > { %969 = vmatpush3.msra.mxu0 %v598_v21 }
  0xaa   : > { %970 = vmatprep.subr.mxu0 %v1297_v0 }
 0x155   : > { %v441_v23 = vpop.f32.mrf.mxu0 }
 0x156   : > { %v442_v24 = vadd.f32 %v441_v23, %v374_v22  ;;  %v597_v22 = vld [vmem:[#allocation10 + $0x28] sm:$0xff]  ;;  %v596_v23 = vld [vmem:[#allocation10 + $0x20] sm:$0xff] }
 0x157   : > { %v914_v25 = vpop.f32.mrf.mxu0  ;;  %971 = vmatpush3.msra.mxu0 %v597_v22 }
 0x158   : > { %445 = vadd.xlane.f32.xlu0 %v442_v24  ;;  %972 = vmatprep.subr.mxu0 %v1297_v0  ;;  %v594_v25 = vld [vmem:[#allocation10 + $0x10] sm:$0xff] }
 0x159   : > { %973 = vmatpush3.msra.mxu0 %v596_v23 }
 0x15a   : > { %974 = vmatprep.subr.mxu0 %v1297_v0 }
 0x1e1   : > { %v446_v27 = vpop.xlane.xlu0 %445 }
 0x1e2   : > { %v447_v28 = vmul.f32 0.010416667, %v446_v27  ;;  %v592_v27 = vld [vmem:[#allocation10] sm:$0xff] }
 0x1e4   : > { %v448_v29 = vsub.f32 %v442_v24, %v447_v28  ;;  %v595_v24 = vld [vmem:[#allocation10 + $0x18] sm:$0xff] }
 0x1e5   : > { %975 = vmatpush3.msra.mxu0 %v595_v24 }
 0x1e6   : > { %v451_v30 = vsel %vm352_vm1, %v448_v29, 0.0  ;;  %976 = vmatprep.subr.mxu0 %v1297_v0 }
 0x1e7   : > { %v452_v31 = vmul.f32 %v451_v30, %v451_v30  ;;  %977 = vmatpush3.msra.mxu0 %v594_v25 }
 0x1e8   : > { %978 = vmatprep.subr.mxu0 %v1297_v0 }
 0x1e9   : > { %453 = vadd.xlane.f32.xlu0 %v452_v31  ;;  %979 = vmatpush3.msra.mxu0 %v593_v26  ;;  %v580_v31 = vrot.slane %v1585_v1, %v461_v51 }
 0x1ea   : > { %980 = vmatprep.subr.mxu0 %v1297_v0 }
 0x1eb   : > { %981 = vmatpush3.msra.mxu0 %v592_v27 }
 0x272   : > { %v454_v48 = vpop.xlane.xlu0 %453 }
 0x273   : > { %v455_v49 = vmul.f32 0.010416667, %v454_v48 }
 0x275   : > { %v456_v50 = vadd.f32 1e-05, %v455_v49 }
 0x277   : > { %1076 = vrsqrt.f32 %v456_v50 }
 0x284   : > { %v1077_v54 = vpop.eup %1076 }
 0x285   : > { %v458_v56 = vmul.f32 %v1077_v54, %v448_v29 }
 0x287   : > { %v463_v57 = vmul.f32 %v462_v53, %v458_v56 }
 0x289   : > { %v468_v58 = vadd.f32 %v467_v55, %v463_v57 }
 0x28b   : > { %v470_v59 = vmul.f32 0.70710677, %v468_v58  ;;  %v469_v61 = vmul.f32 0.5, %v468_v58 }
 0x28d   : > { %1078 = verf.f32 %v470_v59 }
 0x29a   : > { %v1079_v60 = vpop.eup %1078 }
 0x29b   : > { %v472_v62 = vadd.f32 1.0, %v1079_v60 }
 0x29d   : > { %v473_v63 = vmul.f32 %v472_v62, %v469_v61 }
 0x29f   : > { %948 = vmatmul.mubr.f32.vlgmr.msra.gmra.mxu1 %v473_v63 }
 0x35f   : > { %v561_v3 = vpop.f32.mrf.mxu1 }
 0x360   : > { %v562_v4 = vadd.f32 %v561_v3, %v494_v2 }
 0x361   : > { %v949_v5 = vpop.f32.mrf.mxu1 }
 0x362   : > { %565 = vadd.xlane.f32.xlu1 %v562_v4 }
 0x3eb   : > { %v566_v6 = vpop.xlane.xlu1 %565 }
 0x3ec   : > { %v567_v7 = vmul.f32 0.010416667, %v566_v6 }
 0x3ee   : > { %v568_v8 = vsub.f32 %v562_v4, %v567_v7 }
 0x3f0   : > { %v569_v9 = vsel %vm352_vm1, %v568_v8, 0.0 }
 0x3f1   : > { %v570_v10 = vmul.f32 %v569_v9, %v569_v9 }
 0x3f3   : > { %571 = vadd.xlane.f32.xlu1 %v570_v10 }
 0x47c   : > { %v572_v28 = vpop.xlane.xlu1 %571 }
 0x47d   : > { %v573_v29 = vmul.f32 0.010416667, %v572_v28 }
 0x47f   : > { %v574_v30 = vadd.f32 1e-05, %v573_v29 }
 0x481   : > { %1080 = vrsqrt.f32 %v574_v30 }
 0x48e   : > { %v1081_v32 = vpop.eup %1080 }
 0x48f   : > { %v576_v34 = vmul.f32 %v1081_v32, %v568_v8 }
 0x491   : > { %v581_v35 = vmul.f32 %v580_v31, %v576_v34 }
 0x493   : > { %v586_v36 = vadd.f32 %v585_v33, %v581_v35 }
 0x495   : > { %v588_v0 = vmul.f32 0.70710677, %v586_v36  ;;  %v587_v38 = vmul.f32 0.5, %v586_v36 }
 0x497   : > { %1082 = verf.f32 %v588_v0 }
 0x4a4   : > { %v1083_v37 = vpop.eup %1082 }
 0x4a5   : > { %v590_v39 = vadd.f32 1.0, %v1083_v37 }
 0x4a7   : > { %v591_v40 = vmul.f32 %v590_v39, %v587_v38 }
 0x4a9   : > { %983 = vmatmul.mubr.f32.vlgmr.msra.gmra.mxu0 %v591_v40 }
 0x569   : > { %v681_v19 = vpop.f32.mrf.mxu0 }
 0x56a   : > { %v682_v42 = vadd.f32 %v824_v41, %v681_v19 }
 0x56b   : > { %v984_v43 = vpop.f32.mrf.mxu0 }
 0x56c   : > { %685 = vst [vmem:[%s349_s17] sm:$0xff] %v682_v42 }
 0x56d   : > { %1229 = shalt.err (!%p1226_p11)
}
 0x56e   : > { %s1230_s2 = scalar_lea.hbm %s1622_s12, 128  ;;  %s1234_s15 = scalar_lea.hbm %s1666_s7, 256 }
 0x56f   : > { %p1231_p13 = scmp.ne.s32.totalorder %s1622_s12, %s1230_s2  ;;  %p1235_p4 = scmp.lt.s32.totalorder %s1622_s12, %s1666_s7 }
 0x570   : > { %p1236_p6 = scmp.lt.s32.totalorder %s1234_s15, %s1230_s2 }
 0x571   : > { %p1232_p1 = pnand %p1231_p13, %p1688_p7 }
 0x572   : > { %p1237_p5 = por %p1236_p6, %p1235_p4 }
 0x573   : > { %p1233_p3 = pneg %p1232_p1 }
 0x575   : > { %p1238_p8 = pnand %p1237_p5, %p1233_p3 }
 0x577   : > { %1241 = shalt.err (!%p1238_p8)
}
 0x578   : > { %1003 = dma.vmem_to_hbm [thread:$0]  (%p1688_p7), %s701_s29, 128, %s1622_s12, %s687_s20  }
 0x579 PF: > { %s712_s11 = sand.u32 1, %s1276_s24   ;;  %p1689_p10 = scmp.ne.s32.totalorder %s1680_s22, 0 }
 0x57a   : > { %p1690_p0 = scmp.ge.s32.totalorder %s1288_s27, 2  ;;  %s713_s17 = scalar_lea.sflag [#allocation4], %s712_s11 }
 0x57c   : > { %p1023_p12 = pnand %p1690_p0, %p1689_p10 }
 0x57e   : > { %p1024_p2 = pneg %p1023_p12 }
 0x580   : > { %1271 = dma.done.wait (%p1024_p2), %s713_s17, 128  }
 0x581   : > { %1273 = vsyncadd (%p1024_p2), %s713_s17, 4294967168  ;;  %p22_p9 = scmp.ge.s32.totalorder %s1438_s14, 4   ;;  %s1691_s24 = smov %s1280_s25 }
 0x582   : > { %s1692_s25 = smov %s1284_s26  ;;  %s1693_s26 = smov %s1449_s19 }
 0x583   : > { %s1694_s27 = smov %s1438_s14  ;;  %24 = sbr.rel (!%p22_p9) target bundleno = 10 (0xa), region = 109 }
 0x588   :  { %718 = vsyncpa [#allocation3], 1 }
 0x589   :  { %720 = vsyncpa [#allocation3 + $0x1], 1 }
 0x58a   :  { %721 = vsyncpa [#allocation6], 1 }
 0x58b   :  { %722 = vsyncpa [#allocation9], 1 }
 0x58c   :  { %723 = vsyncpa [#allocation4], 1 }
 0x58d   :  { %725 = vsyncpa [#allocation4 + $0x1], 1 }

// kernel: tpu_custom_call.1
= control target key start
LH: loop header
LB: loop body
LE: loop exit
PB: predicated region body
PF: predicated region fallthrough
CT: control target
= control target key end

     0   :  { %s1659_s0 = inlined_call_operand.hbm [shape: f32[16,128], index: 0, kind: input, shape index: {}]   ;;  %s1660_s1 = inlined_call_operand.hbm [shape: f32[128,128], index: 1, kind: input, shape index: {}]   ;;  %s1661_s2 = inlined_call_operand.hbm [shape: f32[3,128], index: 2, kind: input, shape index: {}]   ;;  %s1662_s3 = inlined_call_operand.hbm [shape: f32[128,128], index: 3, kind: input, shape index: {}]   ;;  %s1663_s4 = inlined_call_operand.vmem [shape: f32[3,128], index: 4, kind: input, shape index: {}]   ;;  %s1664_s5 = inlined_call_operand.hbm [shape: f32[128,128], index: 5, kind: input, shape index: {}]   ;;  %s1665_s6 = inlined_call_operand.vmem [shape: f32[1,128], index: 6, kind: input, shape index: {}]   ;;  %s1666_s7 = inlined_call_operand.hbm [shape: f32[16,128], index: 7, kind: output, shape index: {}]  }
   0x1   :  { %1671 = sst [smem:[#allocation16_spill]] %s1660_s1 }
   0x2   :  { %1672 = sst [smem:[#allocation17_spill]] %s1661_s2 }
   0x3   :  { %12 = vsyncpa [#allocation3], 0 }
   0x4   :  { %14 = vsyncpa [#allocation3 + $0x1], 0 }
   0x5   :  { %15 = vsyncpa [#allocation6], 0 }
   0x6   :  { %16 = vsyncpa [#allocation9], 0 }
   0x7   :  { %17 = vsyncpa [#allocation4], 0 }
   0x8   :  { %19 = vsyncpa [#allocation4 + $0x1], 0  ;;  %s1340_s24 = smov 0   ;;  %s1342_s25 = smov 0  }
   0x9   :  { %s1344_s26 = smov 0   ;;  %s1346_s27 = smov 0  }
   0xa LB: > { %s1290_s28 = smov [#allocation5]   ;;  %s1361_s30 = sadd.s32 4294967295, %s1288_s27   ;;  %s1288_s27 = sphi %s1346_s27, %s1694_s27   ;;  %s1284_s26 = sphi %s1344_s26, %s1693_s26   ;;  %s1280_s25 = sphi %s1342_s25, %s1692_s25   ;;  %s1276_s24 = sphi %s1340_s24, %s1691_s24  }
   0xb   : > { %s220_s29 = sshll.u32 %s1290_s28, 4  ;;  %p809_p0 = scmp.ge.s32.totalorder %s1288_s27, 1  ;;  %s221_s29 = int_to_ptr.vmem [resolvable:$true] %s220_s29 }
   0xc   : > { %p1667_p1 = scmp.eq.s32.totalorder %s1361_s30, 0  ;;  %p208_p2 = scmp.lt.s32.totalorder %s1288_s27, 3 }
   0xd   : > { %s1291_s9 = smov [#allocation8]   ;;  %s1292_s12 = smov [#allocation7]  }
   0xe   : > { %p1366_p3 = pnand %p809_p0, %p208_p2  ;;  %s244_s10 = sshll.u32 %s1291_s9, 4  ;;  %s1379_s10 = int_to_ptr.vmem [resolvable:$true] %s244_s10 }
   0xf   : > { %s234_s13 = sshll.u32 %s1292_s12, 4  ;;  %s1095_s14 = scalar_lea.vmem %s221_s29, 2048  ;;  %s1381_s13 = int_to_ptr.vmem [resolvable:$true] %s234_s13 }
  0x10   : > { %s1673_s8 = scalar_select %p1366_p3, 1, 0 }
  0x11   : > { %p1005_p5 = pneg %p1366_p3  ;;  %p1096_p8 = scmp.ne.s32.totalorder %s221_s29, %s1095_s14 }
  0x12   : > { %p1103_p11 = scmp.lt.s32.totalorder %s221_s29, %s221_s29  ;;  %p1104_p12 = scmp.lt.s32.totalorder %s1095_s14, %s1095_s14 }
  0x13   : > { %p1375_p6 = pnand %p1005_p5, %p1667_p1 }
  0x14   : > { %p1105_p13 = por %p1104_p12, %p1103_p11 }
  0x15   : > { %p1086_p7 = pneg %p1375_p6 }
  0x17   : > { %p1098_p9 = pnand %p1096_p8, %p1086_p7 }
  0x19   : > { %p1099_p10 = pneg %p1098_p9 }
  0x1b   : > { %p1106_p0 = pnand %p1105_p13, %p1099_p10 }
  0x1d   : > { %1109 = shalt.err (!%p1106_p0)
}
  0x1e   : > { %s1293_s15 = smov 128   ;;  %s1294_s16 = smov 8  }
  0x1f   : > { %s1675_s1 = sld [smem:[#allocation16_spill]]  ;;  %s1121_s19 = scalar_lea.vmem %s1379_s10, 2048 }
  0x20   : > { %p1122_p2 = scmp.ne.s32.totalorder %s1379_s10, %s1121_s19  ;;  %p1129_p9 = scmp.lt.s32.totalorder %s1379_s10, %s1379_s10 }
  0x21   : > { %p1130_p10 = scmp.lt.s32.totalorder %s1121_s19, %s1121_s19 }
  0x22   : > { %p1124_p5 = pnand %p1122_p2, %p1086_p7 }
  0x23   : > { %p1131_p11 = por %p1130_p10, %p1129_p9 }
  0x24   : > { %p1125_p8 = pneg %p1124_p5 }
  0x25   : > { %1008 = dma.hbm_to_vmem [thread:$0]  (!%p1375_p6), %s1675_s1, 2048, %s221_s29, [#allocation6], %s1293_s15, %s1293_s15, %s1294_s16  }
  0x26   : > { %p1132_p12 = pnand %p1131_p11, %p1125_p8 }
  0x28   : > { %1135 = shalt.err (!%p1132_p12)
}
  0x29   : > { %1014 = dma.hbm_to_vmem [thread:$0]  (!%p1375_p6), %s1662_s3, 2048, %s1379_s10, [#allocation9], %s1293_s15, %s1293_s15, %s1294_s16  }
  0x2a   : > { %s1147_s22 = scalar_lea.vmem %s1381_s13, 64  ;;  %p1155_p5 = scmp.lt.s32.totalorder %s1381_s13, %s1381_s13 }
  0x2b   : > { %p1148_p13 = scmp.ne.s32.totalorder %s1381_s13, %s1147_s22  ;;  %p1156_p8 = scmp.lt.s32.totalorder %s1147_s22, %s1147_s22 }
  0x2d   : > { %p1150_p0 = pnand %p1148_p13, %p1086_p7  ;;  %p1157_p9 = por %p1156_p8, %p1155_p5 }
  0x2f   : > { %p1151_p2 = pneg %p1150_p0 }
  0x31   : > { %p1158_p10 = pnand %p1157_p9, %p1151_p2 }
  0x33   : > { %1161 = shalt.err (!%p1158_p10)
}
  0x34   : > { %s1676_s2 = sld [smem:[#allocation17_spill]]  ;;  %s1295_s29 = smov [#allocation10]  }
  0x35   : > { %s260_s9 = sshll.u32 %s1295_s29, 4  ;;  %s261_s9 = int_to_ptr.vmem [resolvable:$true] %s260_s9 }
  0x36   : > { %s1173_s10 = scalar_lea.vmem %s261_s9, 2048  ;;  %p1181_p0 = scmp.lt.s32.totalorder %s261_s9, %s261_s9 }
  0x37   : > { %p1174_p11 = scmp.ne.s32.totalorder %s261_s9, %s1173_s10  ;;  %p1182_p2 = scmp.lt.s32.totalorder %s1173_s10, %s1173_s10 }
  0x39   : > { %p1176_p12 = pnand %p1174_p11, %p1086_p7  ;;  %p1183_p5 = por %p1182_p2, %p1181_p0 }
  0x3a   : > { %1011 = dma.hbm_to_vmem [thread:$0]  (!%p1375_p6), %s1676_s2, 64, %s1381_s13, [#allocation6]  }
  0x3b   : > { %p1177_p13 = pneg %p1176_p12 }
  0x3d   : > { %p1184_p8 = pnand %p1183_p5, %p1177_p13 }
  0x3f   : > { %1187 = shalt.err (!%p1184_p8)
}
  0x40   : > { %1017 = dma.hbm_to_vmem [thread:$0]  (!%p1375_p6), %s1664_s5, 2048, %s261_s9, [#allocation9], %s1293_s15, %s1293_s15, %s1294_s16  }
  0x41   : > { %s808_s11 = sadd.s32 4294967294, %s1288_s27   ;;  %s1438_s14 = sadd.s32 1, %s1288_s27  }
  0x42   : > { %s29_s17 = ssub.s32 %s1288_s27, %s1438_s14  ;;  %s32_s18 = sadd.s32 1, %s1284_s26 }
  0x43   : > { %p30_p7 = scmp.eq.s32.totalorder %s29_s17, 0  ;;  %p39_p9 = scmp.ne.s32.totalorder %s1284_s26, %s1280_s25 }
  0x44   : > { %p40_p10 = scmp.eq.s32.totalorder %s1288_s27, 0  ;;  %p45_p11 = scmp.ne.s32.totalorder %s1280_s25, %s1276_s24 }
  0x45   : > { %s1449_s19 = scalar_select %p30_p7, %s1284_s26, %s32_s18  }
  0x46   : > { %p1451_p12 = por %p40_p10, %p39_p9  ;;  %p1457_p6 = por %p1667_p1, %p45_p11 }
  0x47   : > { %p195_p13 = scmp.eq.s32.totalorder %s1361_s30, 1  ;;  %p201_p0 = scmp.eq.s32.totalorder %s808_s11, 1 }
  0x48   : > { %s1678_s15 = scalar_select %p1457_p6, 1, 0 }
  0x49   : > { %p1030_p2 = scmp.lt.s32.totalorder %s1288_s27, 2  ;;  %s277_s16 = sand.u32 1, %s1284_s26  }
  0x4a   : > { %p1464_p5 = por %p195_p13, %p39_p9  ;;  %p1468_p8 = por %p201_p0, %p45_p11 }
  0x4b   : > { %s815_s23 = sshll.u32 %s277_s16, 3  ;;  %s816_s28 = sshll.u32 %s1288_s27, 7 }
  0x4c   : > { %s1679_s21 = scalar_select %p1464_p5, 1, 0 }
  0x4d   : > { %s1680_s22 = scalar_select %p1468_p8, 1, 0 }
  0x4e   : > { %s1476_s10 = scalar_lea.hbm %s1659_s0, %s816_s28  ;;  %s281_s12 = scalar_lea.vmem [#allocation2], %s815_s23 }
  0x4f   : > { %s288_s13 = sshll.u32 %s281_s12, 4  ;;  %p1480_p7 = pnand %p1030_p2, %p1451_p12  ;;  %s289_s13 = int_to_ptr.vmem [resolvable:$true] %s288_s13 }
  0x50   : > { %s278_s17 = scalar_lea.sflag [#allocation3], %s277_s16  ;;  %s1188_s18 = scalar_lea.hbm %s1476_s10, 128 }
  0x51   : > { %p1189_p9 = scmp.ne.s32.totalorder %s1476_s10, %s1188_s18  ;;  %p1190_p10 = pneg %p1480_p7 }
  0x52   : > { %s1193_s9 = scalar_lea.hbm %s1659_s0, 256  ;;  %p1194_p0 = scmp.lt.s32.totalorder %s1476_s10, %s1659_s0 }
  0x53   : > { %p1191_p11 = pnand %p1190_p10, %p1189_p9  ;;  %p1195_p12 = scmp.lt.s32.totalorder %s1193_s9, %s1188_s18 }
  0x55   : > { %p1192_p13 = pneg %p1191_p11  ;;  %p1196_p2 = por %p1195_p12, %p1194_p0 }
  0x57   : > { %p1197_p4 = pnand %p1196_p2, %p1192_p13 }
  0x59   : > { %1200 = shalt.err (!%p1197_p4)
}
  0x5a   : > { %s1201_s20 = scalar_lea.vmem %s289_s13, 128  ;;  %s1296_s16 = smov [#allocation2]  }
  0x5b   : > { %p1202_p1 = scmp.ne.s32.totalorder %s289_s13, %s1201_s20  ;;  %s1206_s1 = sshll.u32 %s1296_s16, 4  ;;  %s1207_s1 = int_to_ptr.vmem [resolvable:$false] %s1206_s1 }
  0x5c   : > { %s1208_s2 = scalar_lea.vmem %s1207_s1, 256  ;;  %p1209_p9 = scmp.lt.s32.totalorder %s289_s13, %s1207_s1 }
  0x5d   : > { %p1204_p8 = pnand %p1202_p1, %p1190_p10  ;;  %p1210_p11 = scmp.lt.s32.totalorder %s1208_s2, %s1201_s20 }
  0x5f   : > { %p1205_p5 = pneg %p1204_p8  ;;  %p1211_p6 = por %p1210_p11, %p1209_p9 }
  0x61   : > { %p1212_p3 = pnand %p1211_p6, %p1205_p5 }
  0x63   : > { %1215 = shalt.err (!%p1212_p3)
}
  0x64   : > { %1021 = dma.hbm_to_vmem [thread:$0]  (!%p1480_p7), %s1476_s10, 128, %s289_s13, %s278_s17  }
  0x65   : > { %p1682_p13 = scmp.ne.s32.totalorder %s1673_s8, 0 }
  0x66   : > { %s1501_s18 = sand.u32 (!%p1682_p13), 1, %s1280_s25   ;;  %p1683_p1 = scmp.ne.s32.totalorder (!%p1682_p13), %s1678_s15, 0 }
  0x67   : > { %297 = sbr.rel (%p1682_p13) target bundleno = 1401 (0x579), region = 48  ;;  %s818_s28 = sshll.u32 (!%p1682_p13), %s1501_s18, 3 }
  0x68   : > { %s300_s1 = scalar_lea.sflag (!%p1682_p13), [#allocation3], %s1501_s18  ;;  %s1507_s2 = scalar_lea.vmem (!%p1682_p13), [#allocation2], %s818_s28 }
  0x6c   : > { %1259 = dma.done.wait (%p1683_p1), %s300_s1, 128  }
  0x6d   : > { %1261 = vsyncadd (%p1683_p1), %s300_s1, 4294967168  ;;  %p1684_p3 = scmp.eq.s32.totalorder %s1361_s30, 0 }
  0x6f   : > { %1263 = dma.done.wait (%p1684_p3), [#allocation6], 2112   ;;  %p1685_p4 = pmov %p1684_p3 }
  0x70   : > { %p1686_p6 = pmov %p1684_p3 }
  0x71   : > { %1265 = vsyncadd (%p1685_p4), [#allocation6], 4294965184 }
  0x72   : > { %1267 = dma.done.wait (%p1686_p6), [#allocation9], 4096   ;;  %p1687_p5 = pmov %p1684_p3 }
  0x73   : > { %v1297_v0 = vmov 0.0   ;;  %vm1298_vm0 = vmmov 0   ;;  %v369_v1 = vld [vmem:[#allocation5 + $0x78] sm:$0xff]  ;;  %v368_v2 = vld [vmem:[#allocation5 + $0x70] sm:$0xff]  ;;  %v367_v3 = vld [vmem:[#allocation5 + $0x68] sm:$0xff]  ;;  %v350_v18 = vlaneseq  ;;  %s826_s11 = sshll.u32 %s1361_s30, 7 }
  0x74   : > { %1269 = vsyncadd (%p1687_p5), [#allocation9], 4294963200  ;;  %880 = vmatprep.subr.mxu0 %v1297_v0  ;;  %912 = vmatprep.mubr.msk.f32.mxu0 %vm1298_vm0, %v1297_v0  ;;  %v366_v4 = vld [vmem:[#allocation5 + $0x60] sm:$0xff]  ;;  %v365_v5 = vld [vmem:[#allocation5 + $0x58] sm:$0xff]  ;;  %s349_s17 = scalar_lea.vmem [#allocation11], %s818_s28  ;;  %s1622_s12 = scalar_lea.hbm %s1666_s7, %s826_s11 }
  0x75   : > { %915 = vmatprep.subr.mxu1 %v1297_v0  ;;  %947 = vmatprep.mubr.msk.f32.mxu1 %vm1298_vm0, %v1297_v0  ;;  %v364_v6 = vld [vmem:[#allocation5 + $0x50] sm:$0xff]  ;;  %v363_v7 = vld [vmem:[#allocation5 + $0x48] sm:$0xff]  ;;  %v362_v8 = vld [vmem:[#allocation5 + $0x40] sm:$0xff]  ;;  %v1546_v19 = vshrl.u32 %v350_v18, 7  ;;  %v1554_v26 = vand.u32 127, %v350_v18  ;;  %s700_s29 = sshll.u32 %s349_s17, 4  ;;  %s701_s29 = int_to_ptr.vmem [resolvable:$true] %s700_s29 }
  0x76   : > { %881 = vmatpush3.msra.mxu0 %v369_v1  ;;  %v361_v9 = vld [vmem:[#allocation5 + $0x38] sm:$0xff]  ;;  %v360_v10 = vld [vmem:[#allocation5 + $0x30] sm:$0xff]  ;;  %v359_v11 = vld [vmem:[#allocation5 + $0x28] sm:$0xff]  ;;  %s687_s20 = scalar_lea.sflag [#allocation4], %s1501_s18  ;;  %s1216_s16 = scalar_lea.vmem %s701_s29, 128 }
  0x77   : > { %882 = vmatprep.subr.mxu0 %v1297_v0  ;;  %v358_v12 = vld [vmem:[#allocation5 + $0x20] sm:$0xff]  ;;  %v357_v13 = vld [vmem:[#allocation5 + $0x18] sm:$0xff]  ;;  %v356_v14 = vld [vmem:[#allocation5 + $0x10] sm:$0xff]  ;;  %v373_v20 = vsub.s32 0, %v1546_v19  ;;  %vm352_vm1 = vcmp.lt.s32.totalorder %v1554_v26, 96  ;;  %v461_v51 = vsub.s32 1, %v1546_v19  ;;  %p1217_p8 = scmp.ne.s32.totalorder %s701_s29, %s1216_s16 }
  0x78   : > { %883 = vmatpush3.msra.mxu0 %v368_v2  ;;  %v355_v15 = vld [vmem:[#allocation5 + $0x8] sm:$0xff]  ;;  %v354_v16 = vld [vmem:[#allocation5] sm:$0xff]  ;;  %v353_v17 = vld [vmem:[%s1507_s2] sm:$0xff]  ;;  %v466_v52 = vsub.s32 2, %v1546_v19  ;;  %p1688_p7 = scmp.ne.s32.totalorder %s1679_s21, 0  ;;  %s1299_s30 = smov [#allocation11]  }
  0x79   : > { %884 = vmatprep.subr.mxu0 %v1297_v0  ;;  %v1549_v21 = vld [vmem:[#allocation7] sm:$0x7]  ;;  %v488_v33 = vld [vmem:[#allocation8 + $0x70] sm:$0xff]  ;;  %v487_v34 = vld [vmem:[#allocation8 + $0x68] sm:$0xff]  ;;  %s1220_s1 = sshll.u32 %s1299_s30, 4  ;;  %s1221_s1 = int_to_ptr.vmem [resolvable:$false] %s1220_s1 }
  0x7a   : > { %885 = vmatpush3.msra.mxu0 %v367_v3  ;;  %v374_v22 = vrot.slane %v1549_v21, %v373_v20  ;;  %v489_v32 = vld [vmem:[#allocation8 + $0x78] sm:$0xff]  ;;  %v486_v35 = vld [vmem:[#allocation8 + $0x60] sm:$0xff]  ;;  %v484_v37 = vld [vmem:[#allocation8 + $0x50] sm:$0xff]  ;;  %v462_v53 = vrot.slane %v1549_v21, %v461_v51  ;;  %v467_v55 = vrot.slane %v1549_v21, %v466_v52  ;;  %p1218_p10 = pnand %p1217_p8, %p1688_p7  ;;  %s1222_s28 = scalar_lea.vmem %s1221_s1, 256 }
  0x7b   : > { %886 = vmatprep.subr.mxu0 %v1297_v0  ;;  %916 = vmatpush3.msra.mxu1 %v489_v32  ;;  %v485_v36 = vld [vmem:[#allocation8 + $0x58] sm:$0xff]  ;;  %v483_v38 = vld [vmem:[#allocation8 + $0x48] sm:$0xff]  ;;  %v482_v39 = vld [vmem:[#allocation8 + $0x40] sm:$0xff]  ;;  %p1223_p12 = scmp.lt.s32.totalorder %s701_s29, %s1221_s1  ;;  %p1224_p2 = scmp.lt.s32.totalorder %s1222_s28, %s1216_s16 }
  0x7c   : > { %887 = vmatpush3.msra.mxu0 %v366_v4  ;;  %917 = vmatprep.subr.mxu1 %v1297_v0  ;;  %v481_v40 = vld [vmem:[#allocation8 + $0x38] sm:$0xff]  ;;  %v480_v41 = vld [vmem:[#allocation8 + $0x30] sm:$0xff]  ;;  %v479_v42 = vld [vmem:[#allocation8 + $0x28] sm:$0xff]  ;;  %p1219_p0 = pneg %p1218_p10 }
  0x7d   : > { %888 = vmatprep.subr.mxu0 %v1297_v0  ;;  %918 = vmatpush3.msra.mxu1 %v488_v33  ;;  %v478_v43 = vld [vmem:[#allocation8 + $0x20] sm:$0xff]  ;;  %v477_v44 = vld [vmem:[#allocation8 + $0x18] sm:$0xff]  ;;  %v476_v45 = vld [vmem:[#allocation8 + $0x10] sm:$0xff]  ;;  %p1225_p9 = por %p1224_p2, %p1223_p12 }
  0x7e   : > { %889 = vmatpush3.msra.mxu0 %v365_v5  ;;  %919 = vmatprep.subr.mxu1 %v1297_v0  ;;  %v475_v46 = vld [vmem:[#allocation8 + $0x8] sm:$0xff]  ;;  %v474_v47 = vld [vmem:[#allocation8] sm:$0xff]  ;;  %v598_v21 = vld [vmem:[#allocation10 + $0x30] sm:$0xff] }
  0x7f   : > { %890 = vmatprep.subr.mxu0 %v1297_v0  ;;  %920 = vmatpush3.msra.mxu1 %v487_v34  ;;  %v1585_v1 = vld [vmem:[%s1663_s4] sm:$0x7]  ;;  %v600_v18 = vld [vmem:[#allocation10 + $0x40] sm:$0xff]  ;;  %p1226_p11 = pnand %p1225_p9, %p1219_p0 }
  0x80   : > { %891 = vmatpush3.msra.mxu0 %v364_v6  ;;  %921 = vmatprep.subr.mxu1 %v1297_v0  ;;  %v494_v2 = vrot.slane %v1585_v1, %v373_v20  ;;  %v599_v20 = vld [vmem:[#allocation10 + $0x38] sm:$0xff]  ;;  %v593_v26 = vld [vmem:[#allocation10 + $0x8] sm:$0xff]  ;;  %v585_v33 = vrot.slane %v1585_v1, %v466_v52 }
  0x81   : > { %892 = vmatprep.subr.mxu0 %v1297_v0  ;;  %922 = vmatpush3.msra.mxu1 %v486_v35 }
  0x82   : > { %893 = vmatpush3.msra.mxu0 %v363_v7  ;;  %923 = vmatprep.subr.mxu1 %v1297_v0 }
  0x83   : > { %894 = vmatprep.subr.mxu0 %v1297_v0  ;;  %924 = vmatpush3.msra.mxu1 %v485_v36 }
  0x84   : > { %895 = vmatpush3.msra.mxu0 %v362_v8  ;;  %925 = vmatprep.subr.mxu1 %v1297_v0 }
  0x85   : > { %896 = vmatprep.subr.mxu0 %v1297_v0  ;;  %926 = vmatpush3.msra.mxu1 %v484_v37 }
  0x86   : > { %897 = vmatpush3.msra.mxu0 %v361_v9  ;;  %927 = vmatprep.subr.mxu1 %v1297_v0 }
  0x87   : > { %898 = vmatprep.subr.mxu0 %v1297_v0  ;;  %928 = vmatpush3.msra.mxu1 %v483_v38 }
  0x88   : > { %899 = vmatpush3.msra.mxu0 %v360_v10  ;;  %929 = vmatprep.subr.mxu1 %v1297_v0 }
  0x89   : > { %900 = vmatprep.subr.mxu0 %v1297_v0  ;;  %930 = vmatpush3.msra.mxu1 %v482_v39 }
  0x8a   : > { %901 = vmatpush3.msra.mxu0 %v359_v11  ;;  %931 = vmatprep.subr.mxu1 %v1297_v0  ;;  %v607_v11 = vld [vmem:[#allocation10 + $0x78] sm:$0xff] }
  0x8b   : > { %902 = vmatprep.subr.mxu0 %v1297_v0  ;;  %932 = vmatpush3.msra.mxu1 %v481_v40 }
  0x8c   : > { %903 = vmatpush3.msra.mxu0 %v358_v12  ;;  %933 = vmatprep.subr.mxu1 %v1297_v0  ;;  %v606_v12 = vld [vmem:[#allocation10 + $0x70] sm:$0xff] }
  0x8d   : > { %904 = vmatprep.subr.mxu0 %v1297_v0  ;;  %934 = vmatpush3.msra.mxu1 %v480_v41  ;;  %v824_v41 = vld [vmem:[%s1665_s6] ss:$0 sm:$0xff] }
  0x8e   : > { %905 = vmatpush3.msra.mxu0 %v357_v13  ;;  %935 = vmatprep.subr.mxu1 %v1297_v0  ;;  %v605_v13 = vld [vmem:[#allocation10 + $0x68] sm:$0xff] }
  0x8f   : > { %906 = vmatprep.subr.mxu0 %v1297_v0  ;;  %936 = vmatpush3.msra.mxu1 %v479_v42 }
  0x90   : > { %907 = vmatpush3.msra.mxu0 %v356_v14  ;;  %937 = vmatprep.subr.mxu1 %v1297_v0  ;;  %v604_v14 = vld [vmem:[#allocation10 + $0x60] sm:$0xff] }
  0x91   : > { %908 = vmatprep.subr.mxu0 %v1297_v0  ;;  %938 = vmatpush3.msra.mxu1 %v478_v43 }
  0x92   : > { %909 = vmatpush3.msra.mxu0 %v355_v15  ;;  %939 = vmatprep.subr.mxu1 %v1297_v0  ;;  %v603_v15 = vld [vmem:[#allocation10 + $0x58] sm:$0xff] }
  0x93   : > { %910 = vmatprep.subr.mxu0 %v1297_v0  ;;  %940 = vmatpush3.msra.mxu1 %v477_v44 }
  0x94   : > { %911 = vmatpush3.msra.mxu0 %v354_v16  ;;  %941 = vmatprep.subr.mxu1 %v1297_v0  ;;  %v602_v16 = vld [vmem:[#allocation10 + $0x50] sm:$0xff] }
  0x95   : > { %913 = vmatmul.mubr.f32.vlgmr.msra.gmra.mxu0 %v353_v17  ;;  %950 = vmatprep.subr.mxu0 %v1297_v0  ;;  %v601_v17 = vld [vmem:[#allocation10 + $0x48] sm:$0xff] }
  0x96   : > { %982 = vmatprep.mubr.msk.f32.mxu0 %vm1298_vm0, %v1297_v0  ;;  %942 = vmatpush3.msra.mxu1 %v476_v45 }
  0x97   : > { %943 = vmatprep.subr.mxu1 %v1297_v0  ;;  %951 = vmatpush3.msra.mxu0 %v607_v11 }
  0x98   : > { %944 = vmatpush3.msra.mxu1 %v475_v46  ;;  %952 = vmatprep.subr.mxu0 %v1297_v0 }
  0x99   : > { %945 = vmatprep.subr.mxu1 %v1297_v0  ;;  %953 = vmatpush3.msra.mxu0 %v606_v12 }
  0x9a   : > { %946 = vmatpush3.msra.mxu1 %v474_v47  ;;  %954 = vmatprep.subr.mxu0 %v1297_v0 }
  0x9b   : > { %955 = vmatpush3.msra.mxu0 %v605_v13 }
  0x9c   : > { %956 = vmatprep.subr.mxu0 %v1297_v0 }
  0x9d   : > { %957 = vmatpush3.msra.mxu0 %v604_v14 }
  0x9e   : > { %958 = vmatprep.subr.mxu0 %v1297_v0 }
  0x9f   : > { %959 = vmatpush3.msra.mxu0 %v603_v15 }
  0xa0   : > { %960 = vmatprep.subr.mxu0 %v1297_v0 }
  0xa1   : > { %961 = vmatpush3.msra.mxu0 %v602_v16 }
  0xa2   : > { %962 = vmatprep.subr.mxu0 %v1297_v0 }
  0xa3   : > { %963 = vmatpush3.msra.mxu0 %v601_v17 }
  0xa4   : > { %964 = vmatprep.subr.mxu0 %v1297_v0 }
  0xa5   : > { %965 = vmatpush3.msra.mxu0 %v600_v18 }
  0xa6   : > { %966 = vmatprep.subr.mxu0 %v1297_v0 }
  0xa7   : > { %967 = vmatpush3.msra.mxu0 %v599_v20 }
  0xa8   : > { %968 = vmatprep.subr.mxu0 %v1297_v0 }
  0xa9   : > { %969 = vmatpush3.msra.mxu0 %v598_v21 }
  0xaa   : > { %970 = vmatprep.subr.mxu0 %v1297_v0 }
 0x155   : > { %v441_v23 = vpop.f32.mrf.mxu0 }
 0x156   : > { %v442_v24 = vadd.f32 %v441_v23, %v374_v22  ;;  %v597_v22 = vld [vmem:[#allocation10 + $0x28] sm:$0xff]  ;;  %v596_v23 = vld [vmem:[#allocation10 + $0x20] sm:$0xff] }
 0x157   : > { %v914_v25 = vpop.f32.mrf.mxu0  ;;  %971 = vmatpush3.msra.mxu0 %v597_v22 }
 0x158   : > { %445 = vadd.xlane.f32.xlu0 %v442_v24  ;;  %972 = vmatprep.subr.mxu0 %v1297_v0  ;;  %v594_v25 = vld [vmem:[#allocation10 + $0x10] sm:$0xff] }
 0x159   : > { %973 = vmatpush3.msra.mxu0 %v596_v23 }
 0x15a   : > { %974 = vmatprep.subr.mxu0 %v1297_v0 }
 0x1e1   : > { %v446_v27 = vpop.xlane.xlu0 %445 }
 0x1e2   : > { %v447_v28 = vmul.f32 0.010416667, %v446_v27  ;;  %v592_v27 = vld [vmem:[#allocation10] sm:$0xff] }
 0x1e4   : > { %v448_v29 = vsub.f32 %v442_v24, %v447_v28  ;;  %v595_v24 = vld [vmem:[#allocation10 + $0x18] sm:$0xff] }
 0x1e5   : > { %975 = vmatpush3.msra.mxu0 %v595_v24 }
 0x1e6   : > { %v451_v30 = vsel %vm352_vm1, %v448_v29, 0.0  ;;  %976 = vmatprep.subr.mxu0 %v1297_v0 }
 0x1e7   : > { %v452_v31 = vmul.f32 %v451_v30, %v451_v30  ;;  %977 = vmatpush3.msra.mxu0 %v594_v25 }
 0x1e8   : > { %978 = vmatprep.subr.mxu0 %v1297_v0 }
 0x1e9   : > { %453 = vadd.xlane.f32.xlu0 %v452_v31  ;;  %979 = vmatpush3.msra.mxu0 %v593_v26  ;;  %v580_v31 = vrot.slane %v1585_v1, %v461_v51 }
 0x1ea   : > { %980 = vmatprep.subr.mxu0 %v1297_v0 }
 0x1eb   : > { %981 = vmatpush3.msra.mxu0 %v592_v27 }
 0x272   : > { %v454_v48 = vpop.xlane.xlu0 %453 }
 0x273   : > { %v455_v49 = vmul.f32 0.010416667, %v454_v48 }
 0x275   : > { %v456_v50 = vadd.f32 1e-05, %v455_v49 }
 0x277   : > { %1076 = vrsqrt.f32 %v456_v50 }
 0x284   : > { %v1077_v54 = vpop.eup %1076 }
 0x285   : > { %v458_v56 = vmul.f32 %v1077_v54, %v448_v29 }
 0x287   : > { %v463_v57 = vmul.f32 %v462_v53, %v458_v56 }
 0x289   : > { %v468_v58 = vadd.f32 %v467_v55, %v463_v57 }
 0x28b   : > { %v470_v59 = vmul.f32 0.70710677, %v468_v58  ;;  %v469_v61 = vmul.f32 0.5, %v468_v58 }
 0x28d   : > { %1078 = verf.f32 %v470_v59 }
 0x29a   : > { %v1079_v60 = vpop.eup %1078 }
 0x29b   : > { %v472_v62 = vadd.f32 1.0, %v1079_v60 }
 0x29d   : > { %v473_v63 = vmul.f32 %v472_v62, %v469_v61 }
 0x29f   : > { %948 = vmatmul.mubr.f32.vlgmr.msra.gmra.mxu1 %v473_v63 }
 0x35f   : > { %v561_v3 = vpop.f32.mrf.mxu1 }
 0x360   : > { %v562_v4 = vadd.f32 %v561_v3, %v494_v2 }
 0x361   : > { %v949_v5 = vpop.f32.mrf.mxu1 }
 0x362   : > { %565 = vadd.xlane.f32.xlu1 %v562_v4 }
 0x3eb   : > { %v566_v6 = vpop.xlane.xlu1 %565 }
 0x3ec   : > { %v567_v7 = vmul.f32 0.010416667, %v566_v6 }
 0x3ee   : > { %v568_v8 = vsub.f32 %v562_v4, %v567_v7 }
 0x3f0   : > { %v569_v9 = vsel %vm352_vm1, %v568_v8, 0.0 }
 0x3f1   : > { %v570_v10 = vmul.f32 %v569_v9, %v569_v9 }
 0x3f3   : > { %571 = vadd.xlane.f32.xlu1 %v570_v10 }
 0x47c   : > { %v572_v28 = vpop.xlane.xlu1 %571 }
 0x47d   : > { %v573_v29 = vmul.f32 0.010416667, %v572_v28 }
 0x47f   : > { %v574_v30 = vadd.f32 1e-05, %v573_v29 }
 0x481   : > { %1080 = vrsqrt.f32 %v574_v30 }
 0x48e   : > { %v1081_v32 = vpop.eup %1080 }
 0x48f   : > { %v576_v34 = vmul.f32 %v1081_v32, %v568_v8 }
 0x491   : > { %v581_v35 = vmul.f32 %v580_v31, %v576_v34 }
 0x493   : > { %v586_v36 = vadd.f32 %v585_v33, %v581_v35 }
 0x495   : > { %v588_v0 = vmul.f32 0.70710677, %v586_v36  ;;  %v587_v38 = vmul.f32 0.5, %v586_v36 }
 0x497   : > { %1082 = verf.f32 %v588_v0 }
 0x4a4   : > { %v1083_v37 = vpop.eup %1082 }
 0x4a5   : > { %v590_v39 = vadd.f32 1.0, %v1083_v37 }
 0x4a7   : > { %v591_v40 = vmul.f32 %v590_v39, %v587_v38 }
 0x4a9   : > { %983 = vmatmul.mubr.f32.vlgmr.msra.gmra.mxu0 %v591_v40 }
 0x569   : > { %v681_v19 = vpop.f32.mrf.mxu0 }
 0x56a   : > { %v682_v42 = vadd.f32 %v824_v41, %v681_v19 }
 0x56b   : > { %v984_v43 = vpop.f32.mrf.mxu0 }
 0x56c   : > { %685 = vst [vmem:[%s349_s17] sm:$0xff] %v682_v42 }
 0x56d   : > { %1229 = shalt.err (!%p1226_p11)
}
 0x56e   : > { %s1230_s2 = scalar_lea.hbm %s1622_s12, 128  ;;  %s1234_s15 = scalar_lea.hbm %s1666_s7, 256 }
 0x56f   : > { %p1231_p13 = scmp.ne.s32.totalorder %s1622_s12, %s1230_s2  ;;  %p1235_p4 = scmp.lt.s32.totalorder %s1622_s12, %s1666_s7 }
 0x570   : > { %p1236_p6 = scmp.lt.s32.totalorder %s1234_s15, %s1230_s2 }
 0x571   : > { %p1232_p1 = pnand %p1231_p13, %p1688_p7 }
 0x572   : > { %p1237_p5 = por %p1236_p6, %p1235_p4 }
 0x573   : > { %p1233_p3 = pneg %p1232_p1 }
 0x575   : > { %p1238_p8 = pnand %p1237_p5, %p1233_p3 }
 0x577   : > { %1241 = shalt.err (!%p1238_p8)
}
 0x578   : > { %1003 = dma.vmem_to_hbm [thread:$0]  (%p1688_p7), %s701_s29, 128, %s1622_s12, %s687_s20  }
 0x579 PF: > { %s712_s11 = sand.u32 1, %s1276_s24   ;;  %p1689_p10 = scmp.ne.s32.totalorder %s1680_s22, 0 }
 0x57a   : > { %p1690_p0 = scmp.ge.s32.totalorder %s1288_s27, 2  ;;  %s713_s17 = scalar_lea.sflag [#allocation4], %s712_s11 }
 0x57c   : > { %p1023_p12 = pnand %p1690_p0, %p1689_p10 }
 0x57e   : > { %p1024_p2 = pneg %p1023_p12 }
 0x580   : > { %1271 = dma.done.wait (%p1024_p2), %s713_s17, 128  }
 0x581   : > { %1273 = vsyncadd (%p1024_p2), %s713_s17, 4294967168  ;;  %p22_p9 = scmp.ge.s32.totalorder %s1438_s14, 4   ;;  %s1691_s24 = smov %s1280_s25 }
 0x582   : > { %s1692_s25 = smov %s1284_s26  ;;  %s1693_s26 = smov %s1449_s19 }
 0x583   : > { %s1694_s27 = smov %s1438_s14  ;;  %24 = sbr.rel (!%p22_p9) target bundleno = 10 (0xa), region = 109 }
 0x588   :  { %718 = vsyncpa [#allocation3], 1 }
 0x589   :  { %720 = vsyncpa [#allocation3 + $0x1], 1 }
 0x58a   :  { %721 = vsyncpa [#allocation6], 1 }
 0x58b   :  { %722 = vsyncpa [#allocation9], 1 }
 0x58c   :  { %723 = vsyncpa [#allocation4], 1 }
 0x58d   :  { %725 = vsyncpa [#allocation4 + $0x1], 1 }

</bundles_post_ra>
